<compile_context>
chip_gen: v5e
topology: v5e:2x2
jax: 0.10.0
libtpu: 0.0.40
codegen_flags: <defaults>
</compile_context>

<pallas_src>
import math

import jax
import jax.numpy as jnp
from jax import lax
from jax.experimental import pallas as pl
from jax.experimental.pallas import tpu as pltpu

# ----------------------------- configuration --------------------------------
HIDDEN = 32
NUM_HEADS = 4
HEAD_DIM = HIDDEN // NUM_HEADS
INTERMEDIATE = 64
NUM_LAYERS = 2
VOCAB = 64
VPAD = 128              # vocab padded lane-dense to 128 for the decoder matmul
MAX_POS = 16
TYPE_VOCAB = 2
PROJECT_DIM = 16        # bridge projection dim
SEQ_LEN = 8
BATCH = 2
LN_EPS = 1e-7


# ------------------------------- helpers -------------------------------------
def _ln(x, g, b):
    mu = jnp.mean(x, axis=-1, keepdims=True)
    var = jnp.mean((x - mu) ** 2, axis=-1, keepdims=True)
    return (x - mu) * lax.rsqrt(var + LN_EPS) * g + b


def _bf16(x):
    return x.astype(jnp.bfloat16)


# ------------------------------ fused kernel ----------------------------------
def _fused_forward_kernel(
        emb_ref, kmask_ref, tmask_ref, lbl_ref,
        embg_ref, embb_ref,
        wqkv_ref, bqkv_ref, wo_ref, bo_ref,
        ln1g_ref, ln1b_ref, w1_ref, b1_ref, w2_ref, b2_ref, ln2g_ref, ln2b_ref,
        hdw_ref, hdb_ref, hlng_ref, hlnb_ref, decw_ref, decb_ref,
        brgw_ref, brgb_ref,
        part_ref):
    s_len = emb_ref.shape[0]

    # ---- in-kernel mask / bias construction (no dense host-side inputs) ------
    kmask = kmask_ref[...]                                   # (1, S) 0/1 f32
    bias = (kmask - 1.0) * 1e9                               # 0 valid / -1e9 pad
    tmask = tmask_ref[...]                                   # (S, 1) 0/1 f32

    # per-head lane masks (hoisted out of the layer loop)
    lane = lax.broadcasted_iota(jnp.int32, (1, HIDDEN), 1)
    head_masks = [
        ((lane >= h * HEAD_DIM) & (lane < (h + 1) * HEAD_DIM)).astype(jnp.float32)
        for h in range(NUM_HEADS)]

    # ---- embedding LayerNorm -------------------------------------------------
    x = _ln(emb_ref[...], embg_ref[...], embb_ref[...])      # (S, H) f32

    brg_w = brgw_ref[...]
    brg_b = brgb_ref[...]

    def _bridge_proj(h):
        return jnp.dot(_bf16(h), brg_w,
                       preferred_element_type=jnp.float32) + brg_b

    zs = [_bridge_proj(x)]                                   # (S, P) per layer

    # ---- encoder layers (static unrolled; NUM_LAYERS is small) ---------------
    for l in range(NUM_LAYERS):
        # fused QKV projection: one (S,H)x(H,3H) bf16 MXU matmul, f32 accum.
        qkv = jnp.dot(_bf16(x), wqkv_ref[l],
                      preferred_element_type=jnp.float32) + bqkv_ref[l]
        q = qkv[:, 0 * HIDDEN:1 * HIDDEN]
        k = qkv[:, 1 * HIDDEN:2 * HIDDEN]
        v = qkv[:, 2 * HIDDEN:3 * HIDDEN]

        # head-fused attention: per-head selection via lane masks (no slicing,
        # no concatenation); 1/sqrt(head_dim) already folded into Q weights.
        k_bf = _bf16(k)
        ctx = jnp.zeros((s_len, HIDDEN), jnp.float32)
        for h in range(NUM_HEADS):
            hm = head_masks[h]
            sc = lax.dot_general(_bf16(q * hm), k_bf,
                                 (((1,), (1,)), ((), ())),
                                 preferred_element_type=jnp.float32) + bias
            m = jnp.max(sc, axis=-1, keepdims=True)
            e = jnp.exp(sc - m)
            p = e * pl.reciprocal(jnp.sum(e, axis=-1, keepdims=True),
                                  approx=True)
            ctx = ctx + jnp.dot(_bf16(p), _bf16(v * hm),
                                preferred_element_type=jnp.float32)

        # single full-width output projection
        attn_out = jnp.dot(_bf16(ctx), wo_ref[l],
                           preferred_element_type=jnp.float32) + bo_ref[l]
        h1 = _ln(x + attn_out, ln1g_ref[l], ln1b_ref[l])

        # feed-forward
        # TODO(synk): HF DeBERTa uses exact erf GELU; tanh approximation here.
        ff = jax.nn.gelu(
            jnp.dot(_bf16(h1), w1_ref[l],
                    preferred_element_type=jnp.float32) + b1_ref[l],
            approximate=True)
        ff = jnp.dot(_bf16(ff), w2_ref[l],
                     preferred_element_type=jnp.float32) + b2_ref[l]
        x = _ln(h1 + ff, ln2g_ref[l], ln2b_ref[l])
        zs.append(_bridge_proj(x))

    # ---- MLM head + masked cross-entropy partial sums (ignore_index=-100) ----
    t = jax.nn.gelu(
        jnp.dot(_bf16(x), hdw_ref[...],
                preferred_element_type=jnp.float32) + hdb_ref[...],
        approximate=True)
    t = _ln(t, hlng_ref[...], hlnb_ref[...])
    logits = jnp.dot(_bf16(t), decw_ref[...],
                     preferred_element_type=jnp.float32) + decb_ref[...]  # (S, VPAD)

    col = lax.broadcasted_iota(jnp.int32, (s_len, VPAD), 1)
    lmask = jnp.where(col < VOCAB, logits, -1e30)            # drop pad columns
    m = jnp.max(lmask, axis=-1, keepdims=True)
    lse = jnp.log(jnp.sum(jnp.exp(lmask - m), axis=-1, keepdims=True)) + m

    lbl = lbl_ref[...]                                       # (S, 1) int32
    valid = (lbl >= 0).astype(jnp.float32)                   # 0 at ignore_index
    tgt = jnp.sum(jnp.where(col == lbl, logits, 0.0), axis=-1, keepdims=True)
    nll = (lse - tgt) * valid                                # (S, 1)
    nll_sum = jnp.sum(nll, keepdims=True)                    # (1, 1)
    n_valid = jnp.sum(valid, keepdims=True)                  # (1, 1)

    # ---- Brownian-bridge likelihood partial sums ------------------------------
    z0, zT = zs[0], zs[NUM_LAYERS]
    tok_cnt = jnp.sum(tmask, keepdims=True)                  # (1, 1)
    bridge_sum = jnp.zeros((1, 1), jnp.float32)
    for step in range(1, NUM_LAYERS):
        w = step / NUM_LAYERS
        var = step * (NUM_LAYERS - step) / NUM_LAYERS
        mean = (1.0 - w) * z0 + w * zT
        d = zs[step] - mean
        nll_t = 0.5 * (jnp.sum(d * d, axis=-1, keepdims=True) / var
                       + PROJECT_DIM * math.log(2.0 * math.pi * var))
        bridge_sum = bridge_sum + jnp.sum(nll_t * tmask, keepdims=True)

    # lane-dense partials row: [nll_sum, n_valid, bridge_sum, tok_cnt, 0, ...]
    pc = lax.broadcasted_iota(jnp.int32, (1, 128), 1)
    part_ref[...] = (jnp.where(pc == 0, nll_sum, 0.0)
                     + jnp.where(pc == 1, n_valid, 0.0)
                     + jnp.where(pc == 2, bridge_sum, 0.0)
                     + jnp.where(pc == 3, tok_cnt, 0.0))


# ------------------------------ parameters ------------------------------------
def init_params(key):
    keys = iter(jax.random.split(key, 32))

    def nrm(shape):
        return 0.02 * jax.random.normal(next(keys), shape, jnp.float32)

    word_emb = nrm((VOCAB, HIDDEN))
    params = {
        "word_emb": word_emb,
        "pos_emb": nrm((MAX_POS, HIDDEN)),
        "type_emb": nrm((TYPE_VOCAB, HIDDEN)),
        "emb_ln_g": jnp.ones((1, HIDDEN), jnp.float32),
        "emb_ln_b": jnp.zeros((1, HIDDEN), jnp.float32),
    }

    wqkv, wo, w1, w2 = [], [], [], []
    for _ in range(NUM_LAYERS):
        wq = nrm((HIDDEN, HIDDEN)) / math.sqrt(HEAD_DIM)   # fold 1/sqrt(d) scale
        wk = nrm((HIDDEN, HIDDEN))
        wv = nrm((HIDDEN, HIDDEN))
        wqkv.append(jnp.concatenate([wq, wk, wv], axis=1))  # (H, 3H)
        wo.append(nrm((HIDDEN, HIDDEN)))
        w1.append(nrm((HIDDEN, INTERMEDIATE)))
        w2.append(nrm((INTERMEDIATE, HIDDEN)))

    params.update(
        wqkv=jnp.stack(wqkv).astype(jnp.bfloat16),
        bqkv=jnp.zeros((NUM_LAYERS, 1, 3 * HIDDEN), jnp.float32),
        wo=jnp.stack(wo).astype(jnp.bfloat16),
        bo=jnp.zeros((NUM_LAYERS, 1, HIDDEN), jnp.float32),
        ln1_g=jnp.ones((NUM_LAYERS, 1, HIDDEN), jnp.float32),
        ln1_b=jnp.zeros((NUM_LAYERS, 1, HIDDEN), jnp.float32),
        w1=jnp.stack(w1).astype(jnp.bfloat16),
        b1=jnp.zeros((NUM_LAYERS, 1, INTERMEDIATE), jnp.float32),
        w2=jnp.stack(w2).astype(jnp.bfloat16),
        b2=jnp.zeros((NUM_LAYERS, 1, HIDDEN), jnp.float32),
        ln2_g=jnp.ones((NUM_LAYERS, 1, HIDDEN), jnp.float32),
        ln2_b=jnp.zeros((NUM_LAYERS, 1, HIDDEN), jnp.float32),
        head_dense_w=nrm((HIDDEN, HIDDEN)).astype(jnp.bfloat16),
        head_dense_b=jnp.zeros((1, HIDDEN), jnp.float32),
        head_ln_g=jnp.ones((1, HIDDEN), jnp.float32),
        head_ln_b=jnp.zeros((1, HIDDEN), jnp.float32),
        # decoder tied to word embedding (copied constant; forward-only),
        # padded lane-dense to VPAD columns.
        decoder_w=jnp.pad(word_emb.T,
                          ((0, 0), (0, VPAD - VOCAB))).astype(jnp.bfloat16),
        decoder_b=jnp.zeros((1, VPAD), jnp.float32),
        bridge_w=nrm((HIDDEN, PROJECT_DIM)).astype(jnp.bfloat16),
        bridge_b=jnp.zeros((1, PROJECT_DIM), jnp.float32),
    )
    return params


# ------------------------------ glue / forward ---------------------------------
def bridge_deberta_forward(params, input_ids, attention_mask, token_type_ids,
                           labels):
    b, s = input_ids.shape

    # host-side preprocessing: embedding gathers only (hoisted once).
    position_ids = jnp.broadcast_to(jnp.arange(s, dtype=jnp.int32)[None], (b, s))
    emb = (params["word_emb"][input_ids]
           + params["pos_emb"][position_ids]
           + params["type_emb"][token_type_ids])             # (B, S, H) f32

    kmask_row = attention_mask.astype(jnp.float32).reshape(b, 1, s)
    tmask_col = attention_mask.astype(jnp.float32).reshape(b, s, 1)
    labels_col = labels.astype(jnp.int32).reshape(b, s, 1)

    weights = (params["emb_ln_g"], params["emb_ln_b"],
               params["wqkv"], params["bqkv"], params["wo"], params["bo"],
               params["ln1_g"], params["ln1_b"], params["w1"], params["b1"],
               params["w2"], params["b2"], params["ln2_g"], params["ln2_b"],
               params["head_dense_w"], params["head_dense_b"],
               params["head_ln_g"], params["head_ln_b"],
               params["decoder_w"], params["decoder_b"],
               params["bridge_w"], params["bridge_b"])

    # per-batch blocked activations; grid-invariant weights fully VMEM-resident
    # (single copy, no double buffering).
    act_specs = [
        pl.BlockSpec((None, s, HIDDEN), lambda i: (i, 0, 0)),   # emb
        pl.BlockSpec((None, 1, s), lambda i: (i, 0, 0)),        # key-validity row
        pl.BlockSpec((None, s, 1), lambda i: (i, 0, 0)),        # token mask col
        pl.BlockSpec((None, s, 1), lambda i: (i, 0, 0)),        # labels col
    ]
    vmem_spec = pl.BlockSpec(memory_space=pltpu.MemorySpace.VMEM)

    partials = pl.pallas_call(
        _fused_forward_kernel,
        out_shape=jax.ShapeDtypeStruct((b, 1, 128), jnp.float32),
        grid=(b,),
        in_specs=act_specs + [vmem_spec] * len(weights),
        out_specs=pl.BlockSpec((None, 1, 128), lambda i: (i, 0, 0)),
        compiler_params=pltpu.CompilerParams(
            dimension_semantics=("parallel",)),
    )(emb, kmask_row, tmask_col, labels_col, *weights)

    # final scalar reductions over the per-batch partial sums (tiny, in JAX).
    nll_sum = jnp.sum(partials[:, 0, 0])
    n_valid = jnp.maximum(jnp.sum(partials[:, 0, 1]), 1.0)
    bridge_sum = jnp.sum(partials[:, 0, 2])
    tok_cnt = jnp.maximum(jnp.sum(partials[:, 0, 3]), 1.0)

    mlm_loss = nll_sum / n_valid
    likelihood_loss = bridge_sum / (tok_cnt * max(NUM_LAYERS - 1, 1))
    # reference returns (likelihood_loss, outputs.loss)
    return likelihood_loss, mlm_loss


# ------------------------------ entry point -------------------------------------
if __name__ == "__main__":
    key = jax.random.PRNGKey(0)
    pkey, ikey, lkey = jax.random.split(key, 3)
    params = init_params(pkey)

    input_ids = jax.random.randint(ikey, (BATCH, SEQ_LEN), 0, VOCAB,
                                   dtype=jnp.int32)
    attention_mask = jnp.array([[1, 1, 1, 1, 1, 1, 1, 1],
                                [1, 1, 1, 1, 1, 1, 0, 0]], dtype=jnp.int32)
    token_type_ids = jnp.zeros((BATCH, SEQ_LEN), jnp.int32)
    # MLM labels: supervise positions 0 and 3, ignore (-100) everywhere else.
    rnd_lab = jax.random.randint(lkey, (BATCH, SEQ_LEN), 0, VOCAB,
                                 dtype=jnp.int32)
    pos = jnp.arange(SEQ_LEN)[None, :]
    labels = jnp.where((pos == 0) | (pos == 3), rnd_lab, -100).astype(jnp.int32)

    forward = jax.jit(bridge_deberta_forward)
    likelihood_loss, mlm_loss = forward(
        params, input_ids, attention_mask, token_type_ids, labels)
    jax.block_until_ready((likelihood_loss, mlm_loss))

    assert likelihood_loss.shape == () and mlm_loss.shape == ()
    assert bool(jnp.isfinite(mlm_loss)) and bool(jnp.isfinite(likelihood_loss))
    print("KERNEL_OK")
</pallas_src>

<mosaic_0001>
module attributes {stable_mosaic.version = 11 : i64} {
  func.func @_fused_forward_kernel(%arg0: i32, %arg1: memref<1x8x32xf32, #tpu.memory_space<vmem>>, %arg2: memref<1x1x8xf32, #tpu.memory_space<vmem>>, %arg3: memref<1x8x1xf32, #tpu.memory_space<vmem>>, %arg4: memref<1x8x1xi32, #tpu.memory_space<vmem>>, %arg5: memref<1x32xf32, #tpu.memory_space<vmem>>, %arg6: memref<1x32xf32, #tpu.memory_space<vmem>>, %arg7: memref<2x32x96xbf16, #tpu.memory_space<vmem>>, %arg8: memref<2x1x96xf32, #tpu.memory_space<vmem>>, %arg9: memref<2x32x32xbf16, #tpu.memory_space<vmem>>, %arg10: memref<2x1x32xf32, #tpu.memory_space<vmem>>, %arg11: memref<2x1x32xf32, #tpu.memory_space<vmem>>, %arg12: memref<2x1x32xf32, #tpu.memory_space<vmem>>, %arg13: memref<2x32x64xbf16, #tpu.memory_space<vmem>>, %arg14: memref<2x1x64xf32, #tpu.memory_space<vmem>>, %arg15: memref<2x64x32xbf16, #tpu.memory_space<vmem>>, %arg16: memref<2x1x32xf32, #tpu.memory_space<vmem>>, %arg17: memref<2x1x32xf32, #tpu.memory_space<vmem>>, %arg18: memref<2x1x32xf32, #tpu.memory_space<vmem>>, %arg19: memref<32x32xbf16, #tpu.memory_space<vmem>>, %arg20: memref<1x32xf32, #tpu.memory_space<vmem>>, %arg21: memref<1x32xf32, #tpu.memory_space<vmem>>, %arg22: memref<1x32xf32, #tpu.memory_space<vmem>>, %arg23: memref<32x128xbf16, #tpu.memory_space<vmem>>, %arg24: memref<1x128xf32, #tpu.memory_space<vmem>>, %arg25: memref<32x16xbf16, #tpu.memory_space<vmem>>, %arg26: memref<1x16xf32, #tpu.memory_space<vmem>>, %arg27: memref<1x1x128xf32, #tpu.memory_space<vmem>>) attributes {dimension_semantics = [#tpu.dimension_semantics<parallel>], iteration_bounds = array<i64: 2>, scalar_prefetch = 0 : i64, scratch_operands = 0 : i64, tpu.core_type = #tpu.core_type<tc>, window_params = [{transform_indices = @transform_0, window_bounds = array<i64: 1, 8, 32>}, {transform_indices = @transform_1, window_bounds = array<i64: 1, 1, 8>}, {transform_indices = @transform_2, window_bounds = array<i64: 1, 8, 1>}, {transform_indices = @transform_3, window_bounds = array<i64: 1, 8, 1>}, {pipeline_mode = #tpu.pipeline_mode<synchronous>, transform_indices = @transform_4, window_bounds = array<i64: 1, 32>}, {pipeline_mode = #tpu.pipeline_mode<synchronous>, transform_indices = @transform_5, window_bounds = array<i64: 1, 32>}, {pipeline_mode = #tpu.pipeline_mode<synchronous>, transform_indices = @transform_6, window_bounds = array<i64: 2, 32, 96>}, {pipeline_mode = #tpu.pipeline_mode<synchronous>, transform_indices = @transform_7, window_bounds = array<i64: 2, 1, 96>}, {pipeline_mode = #tpu.pipeline_mode<synchronous>, transform_indices = @transform_8, window_bounds = array<i64: 2, 32, 32>}, {pipeline_mode = #tpu.pipeline_mode<synchronous>, transform_indices = @transform_9, window_bounds = array<i64: 2, 1, 32>}, {pipeline_mode = #tpu.pipeline_mode<synchronous>, transform_indices = @transform_10, window_bounds = array<i64: 2, 1, 32>}, {pipeline_mode = #tpu.pipeline_mode<synchronous>, transform_indices = @transform_11, window_bounds = array<i64: 2, 1, 32>}, {pipeline_mode = #tpu.pipeline_mode<synchronous>, transform_indices = @transform_12, window_bounds = array<i64: 2, 32, 64>}, {pipeline_mode = #tpu.pipeline_mode<synchronous>, transform_indices = @transform_13, window_bounds = array<i64: 2, 1, 64>}, {pipeline_mode = #tpu.pipeline_mode<synchronous>, transform_indices = @transform_14, window_bounds = array<i64: 2, 64, 32>}, {pipeline_mode = #tpu.pipeline_mode<synchronous>, transform_indices = @transform_15, window_bounds = array<i64: 2, 1, 32>}, {pipeline_mode = #tpu.pipeline_mode<synchronous>, transform_indices = @transform_16, window_bounds = array<i64: 2, 1, 32>}, {pipeline_mode = #tpu.pipeline_mode<synchronous>, transform_indices = @transform_17, window_bounds = array<i64: 2, 1, 32>}, {pipeline_mode = #tpu.pipeline_mode<synchronous>, transform_indices = @transform_18, window_bounds = array<i64: 32, 32>}, {pipeline_mode = #tpu.pipeline_mode<synchronous>, transform_indices = @transform_19, window_bounds = array<i64: 1, 32>}, {pipeline_mode = #tpu.pipeline_mode<synchronous>, transform_indices = @transform_20, window_bounds = array<i64: 1, 32>}, {pipeline_mode = #tpu.pipeline_mode<synchronous>, transform_indices = @transform_21, window_bounds = array<i64: 1, 32>}, {pipeline_mode = #tpu.pipeline_mode<synchronous>, transform_indices = @transform_22, window_bounds = array<i64: 32, 128>}, {pipeline_mode = #tpu.pipeline_mode<synchronous>, transform_indices = @transform_23, window_bounds = array<i64: 1, 128>}, {pipeline_mode = #tpu.pipeline_mode<synchronous>, transform_indices = @transform_24, window_bounds = array<i64: 32, 16>}, {pipeline_mode = #tpu.pipeline_mode<synchronous>, transform_indices = @transform_25, window_bounds = array<i64: 1, 16>}, {transform_indices = @transform_26, window_bounds = array<i64: 1, 1, 128>}]} {
    %c0 = arith.constant 0 : index
    %c0_0 = arith.constant 0 : index
    %c0_1 = arith.constant 0 : index
    %0 = vector.load %arg2[%c0, %c0_0, %c0_1] : memref<1x1x8xf32, #tpu.memory_space<vmem>>, vector<1x1x8xf32>
    %1 = vector.shape_cast %0 : vector<1x1x8xf32> to vector<1x8xf32>
    %cst = arith.constant 1.000000e+00 : f32
    %2 = vector.broadcast %cst : f32 to vector<1x8xf32>
    %3 = arith.subf %1, %2 : vector<1x8xf32>
    %cst_2 = arith.constant 1.000000e+09 : f32
    %4 = vector.broadcast %cst_2 : f32 to vector<1x8xf32>
    %5 = arith.mulf %3, %4 : vector<1x8xf32>
    %c0_3 = arith.constant 0 : index
    %c0_4 = arith.constant 0 : index
    %c0_5 = arith.constant 0 : index
    %6 = vector.load %arg3[%c0_3, %c0_4, %c0_5] : memref<1x8x1xf32, #tpu.memory_space<vmem>>, vector<1x8x1xf32>
    %7 = vector.shape_cast %6 : vector<1x8x1xf32> to vector<8x1xf32>
    %8 = tpu.iota {dimensions = array<i32: 1>} : vector<1x32xi32>
    %c0_i32 = arith.constant 0 : i32
    %9 = vector.broadcast %c0_i32 : i32 to vector<1x32xi32>
    %10 = arith.cmpi sge, %8, %9 : vector<1x32xi32>
    %c8_i32 = arith.constant 8 : i32
    %11 = vector.broadcast %c8_i32 : i32 to vector<1x32xi32>
    %12 = arith.cmpi slt, %8, %11 : vector<1x32xi32>
    %13 = arith.andi %10, %12 : vector<1x32xi1>
    %14 = arith.extui %13 : vector<1x32xi1> to vector<1x32xi32>
    %15 = arith.sitofp %14 : vector<1x32xi32> to vector<1x32xf32>
    %c8_i32_6 = arith.constant 8 : i32
    %16 = vector.broadcast %c8_i32_6 : i32 to vector<1x32xi32>
    %17 = arith.cmpi sge, %8, %16 : vector<1x32xi32>
    %c16_i32 = arith.constant 16 : i32
    %18 = vector.broadcast %c16_i32 : i32 to vector<1x32xi32>
    %19 = arith.cmpi slt, %8, %18 : vector<1x32xi32>
    %20 = arith.andi %17, %19 : vector<1x32xi1>
    %21 = arith.extui %20 : vector<1x32xi1> to vector<1x32xi32>
    %22 = arith.sitofp %21 : vector<1x32xi32> to vector<1x32xf32>
    %c16_i32_7 = arith.constant 16 : i32
    %23 = vector.broadcast %c16_i32_7 : i32 to vector<1x32xi32>
    %24 = arith.cmpi sge, %8, %23 : vector<1x32xi32>
    %c24_i32 = arith.constant 24 : i32
    %25 = vector.broadcast %c24_i32 : i32 to vector<1x32xi32>
    %26 = arith.cmpi slt, %8, %25 : vector<1x32xi32>
    %27 = arith.andi %24, %26 : vector<1x32xi1>
    %28 = arith.extui %27 : vector<1x32xi1> to vector<1x32xi32>
    %29 = arith.sitofp %28 : vector<1x32xi32> to vector<1x32xf32>
    %c24_i32_8 = arith.constant 24 : i32
    %30 = vector.broadcast %c24_i32_8 : i32 to vector<1x32xi32>
    %31 = arith.cmpi sge, %8, %30 : vector<1x32xi32>
    %c32_i32 = arith.constant 32 : i32
    %32 = vector.broadcast %c32_i32 : i32 to vector<1x32xi32>
    %33 = arith.cmpi slt, %8, %32 : vector<1x32xi32>
    %34 = arith.andi %31, %33 : vector<1x32xi1>
    %35 = arith.extui %34 : vector<1x32xi1> to vector<1x32xi32>
    %36 = arith.sitofp %35 : vector<1x32xi32> to vector<1x32xf32>
    %c0_9 = arith.constant 0 : index
    %c0_10 = arith.constant 0 : index
    %c0_11 = arith.constant 0 : index
    %37 = vector.load %arg1[%c0_9, %c0_10, %c0_11] : memref<1x8x32xf32, #tpu.memory_space<vmem>>, vector<1x8x32xf32>
    %38 = vector.shape_cast %37 : vector<1x8x32xf32> to vector<8x32xf32>
    %c0_12 = arith.constant 0 : index
    %c0_13 = arith.constant 0 : index
    %39 = vector.load %arg5[%c0_12, %c0_13] : memref<1x32xf32, #tpu.memory_space<vmem>>, vector<1x32xf32>
    %c0_14 = arith.constant 0 : index
    %c0_15 = arith.constant 0 : index
    %40 = vector.load %arg6[%c0_14, %c0_15] : memref<1x32xf32, #tpu.memory_space<vmem>>, vector<1x32xf32>
    %cst_16 = arith.constant dense<0.000000e+00> : vector<8xf32>
    %41 = vector.multi_reduction <add>, %38, %cst_16 [1] : vector<8x32xf32> to vector<8xf32>
    %42 = vector.shape_cast %41 : vector<8xf32> to vector<8x1xf32>
    %cst_17 = arith.constant 3.200000e+01 : f32
    %43 = vector.broadcast %cst_17 : f32 to vector<8x1xf32>
    %44 = arith.divf %42, %43 : vector<8x1xf32>
    %45 = vector.broadcast %44 : vector<8x1xf32> to vector<8x32xf32>
    %46 = arith.subf %38, %45 : vector<8x32xf32>
    %47 = arith.mulf %46, %46 : vector<8x32xf32>
    %cst_18 = arith.constant dense<0.000000e+00> : vector<8xf32>
    %48 = vector.multi_reduction <add>, %47, %cst_18 [1] : vector<8x32xf32> to vector<8xf32>
    %49 = vector.shape_cast %48 : vector<8xf32> to vector<8x1xf32>
    %cst_19 = arith.constant 3.200000e+01 : f32
    %50 = vector.broadcast %cst_19 : f32 to vector<8x1xf32>
    %51 = arith.divf %49, %50 : vector<8x1xf32>
    %52 = vector.broadcast %44 : vector<8x1xf32> to vector<8x32xf32>
    %53 = arith.subf %38, %52 : vector<8x32xf32>
    %cst_20 = arith.constant 1.000000e-07 : f32
    %54 = vector.broadcast %cst_20 : f32 to vector<8x1xf32>
    %55 = arith.addf %51, %54 : vector<8x1xf32>
    %56 = math.rsqrt %55 : vector<8x1xf32>
    %57 = vector.broadcast %56 : vector<8x1xf32> to vector<8x32xf32>
    %58 = arith.mulf %53, %57 : vector<8x32xf32>
    %59 = vector.broadcast %39 : vector<1x32xf32> to vector<8x32xf32>
    %60 = arith.mulf %58, %59 : vector<8x32xf32>
    %61 = vector.broadcast %40 : vector<1x32xf32> to vector<8x32xf32>
    %62 = arith.addf %60, %61 : vector<8x32xf32>
    %c0_21 = arith.constant 0 : index
    %c0_22 = arith.constant 0 : index
    %63 = vector.load %arg25[%c0_21, %c0_22] : memref<32x16xbf16, #tpu.memory_space<vmem>>, vector<32x16xbf16>
    %c0_23 = arith.constant 0 : index
    %c0_24 = arith.constant 0 : index
    %64 = vector.load %arg26[%c0_23, %c0_24] : memref<1x16xf32, #tpu.memory_space<vmem>>, vector<1x16xf32>
    %65 = arith.truncf %62 : vector<8x32xf32> to vector<8x32xbf16>
    %cst_25 = arith.constant dense<0.000000e+00> : vector<8x16xf32>
    %66 = tpu.matmul %65, %63, %cst_25 {dimension_numbers = #tpu.dot_dimension_numbers<[1], [0], [0], [1], [0, 0, 1, 1], [], []>} : vector<8x32xbf16>, vector<32x16xbf16>, vector<8x16xf32> -> vector<8x16xf32>
    %67 = vector.broadcast %64 : vector<1x16xf32> to vector<8x16xf32>
    %68 = arith.addf %66, %67 : vector<8x16xf32>
    %69 = arith.truncf %62 : vector<8x32xf32> to vector<8x32xbf16>
    %c0_26 = arith.constant 0 : index
    %c0_27 = arith.constant 0 : index
    %c0_28 = arith.constant 0 : index
    %70 = vector.load %arg7[%c0_26, %c0_27, %c0_28] : memref<2x32x96xbf16, #tpu.memory_space<vmem>>, vector<1x32x96xbf16>
    %71 = vector.shape_cast %70 : vector<1x32x96xbf16> to vector<32x96xbf16>
    %cst_29 = arith.constant dense<0.000000e+00> : vector<8x96xf32>
    %72 = tpu.matmul %69, %71, %cst_29 {dimension_numbers = #tpu.dot_dimension_numbers<[1], [0], [0], [1], [0, 0, 1, 1], [], []>} : vector<8x32xbf16>, vector<32x96xbf16>, vector<8x96xf32> -> vector<8x96xf32>
    %c0_30 = arith.constant 0 : index
    %c0_31 = arith.constant 0 : index
    %c0_32 = arith.constant 0 : index
    %73 = vector.load %arg8[%c0_30, %c0_31, %c0_32] : memref<2x1x96xf32, #tpu.memory_space<vmem>>, vector<1x1x96xf32>
    %74 = vector.shape_cast %73 : vector<1x1x96xf32> to vector<1x96xf32>
    %75 = vector.broadcast %74 : vector<1x96xf32> to vector<8x96xf32>
    %76 = arith.addf %72, %75 : vector<8x96xf32>
    %77 = vector.extract_strided_slice %76 {offsets = [0, 0], sizes = [8, 32], strides = [1, 1]} : vector<8x96xf32> to vector<8x32xf32>
    %78 = vector.extract_strided_slice %76 {offsets = [0, 32], sizes = [8, 32], strides = [1, 1]} : vector<8x96xf32> to vector<8x32xf32>
    %79 = vector.extract_strided_slice %76 {offsets = [0, 64], sizes = [8, 32], strides = [1, 1]} : vector<8x96xf32> to vector<8x32xf32>
    %80 = arith.truncf %78 : vector<8x32xf32> to vector<8x32xbf16>
    %cst_33 = arith.constant 0.000000e+00 : f32
    %81 = vector.broadcast %cst_33 : f32 to vector<8x32xf32>
    %82 = vector.broadcast %15 : vector<1x32xf32> to vector<8x32xf32>
    %83 = arith.mulf %77, %82 : vector<8x32xf32>
    %84 = arith.truncf %83 : vector<8x32xf32> to vector<8x32xbf16>
    %cst_34 = arith.constant dense<0.000000e+00> : vector<8x8xf32>
    %85 = tpu.matmul %84, %80, %cst_34 {dimension_numbers = #tpu.dot_dimension_numbers<[1], [1], [0], [0], [0, 0, 1, 0], [], []>} : vector<8x32xbf16>, vector<8x32xbf16>, vector<8x8xf32> -> vector<8x8xf32>
    %86 = vector.broadcast %5 : vector<1x8xf32> to vector<8x8xf32>
    %87 = arith.addf %85, %86 : vector<8x8xf32>
    %cst_35 = arith.constant dense<0xFF800000> : vector<8xf32>
    %88 = vector.multi_reduction <maximumf>, %87, %cst_35 [1] : vector<8x8xf32> to vector<8xf32>
    %89 = vector.shape_cast %88 : vector<8xf32> to vector<8x1xf32>
    %90 = vector.broadcast %89 : vector<8x1xf32> to vector<8x8xf32>
    %91 = arith.subf %87, %90 : vector<8x8xf32>
    %92 = math.exp %91 : vector<8x8xf32>
    %cst_36 = arith.constant dense<0.000000e+00> : vector<8xf32>
    %93 = vector.multi_reduction <add>, %92, %cst_36 [1] : vector<8x8xf32> to vector<8xf32>
    %94 = vector.shape_cast %93 : vector<8xf32> to vector<8x1xf32>
    %95 = tpu.reciprocal %94 {approx = true} : vector<8x1xf32> -> vector<8x1xf32>
    %96 = vector.broadcast %95 : vector<8x1xf32> to vector<8x8xf32>
    %97 = arith.mulf %92, %96 : vector<8x8xf32>
    %98 = arith.truncf %97 : vector<8x8xf32> to vector<8x8xbf16>
    %99 = vector.broadcast %15 : vector<1x32xf32> to vector<8x32xf32>
    %100 = arith.mulf %79, %99 : vector<8x32xf32>
    %101 = arith.truncf %100 : vector<8x32xf32> to vector<8x32xbf16>
    %cst_37 = arith.constant dense<0.000000e+00> : vector<8x32xf32>
    %102 = tpu.matmul %98, %101, %cst_37 {dimension_numbers = #tpu.dot_dimension_numbers<[1], [0], [0], [1], [0, 0, 1, 1], [], []>} : vector<8x8xbf16>, vector<8x32xbf16>, vector<8x32xf32> -> vector<8x32xf32>
    %103 = arith.addf %81, %102 : vector<8x32xf32>
    %104 = vector.broadcast %22 : vector<1x32xf32> to vector<8x32xf32>
    %105 = arith.mulf %77, %104 : vector<8x32xf32>
    %106 = arith.truncf %105 : vector<8x32xf32> to vector<8x32xbf16>
    %cst_38 = arith.constant dense<0.000000e+00> : vector<8x8xf32>
    %107 = tpu.matmul %106, %80, %cst_38 {dimension_numbers = #tpu.dot_dimension_numbers<[1], [1], [0], [0], [0, 0, 1, 0], [], []>} : vector<8x32xbf16>, vector<8x32xbf16>, vector<8x8xf32> -> vector<8x8xf32>
    %108 = vector.broadcast %5 : vector<1x8xf32> to vector<8x8xf32>
    %109 = arith.addf %107, %108 : vector<8x8xf32>
    %cst_39 = arith.constant dense<0xFF800000> : vector<8xf32>
    %110 = vector.multi_reduction <maximumf>, %109, %cst_39 [1] : vector<8x8xf32> to vector<8xf32>
    %111 = vector.shape_cast %110 : vector<8xf32> to vector<8x1xf32>
    %112 = vector.broadcast %111 : vector<8x1xf32> to vector<8x8xf32>
    %113 = arith.subf %109, %112 : vector<8x8xf32>
    %114 = math.exp %113 : vector<8x8xf32>
    %cst_40 = arith.constant dense<0.000000e+00> : vector<8xf32>
    %115 = vector.multi_reduction <add>, %114, %cst_40 [1] : vector<8x8xf32> to vector<8xf32>
    %116 = vector.shape_cast %115 : vector<8xf32> to vector<8x1xf32>
    %117 = tpu.reciprocal %116 {approx = true} : vector<8x1xf32> -> vector<8x1xf32>
    %118 = vector.broadcast %117 : vector<8x1xf32> to vector<8x8xf32>
    %119 = arith.mulf %114, %118 : vector<8x8xf32>
    %120 = arith.truncf %119 : vector<8x8xf32> to vector<8x8xbf16>
    %121 = vector.broadcast %22 : vector<1x32xf32> to vector<8x32xf32>
    %122 = arith.mulf %79, %121 : vector<8x32xf32>
    %123 = arith.truncf %122 : vector<8x32xf32> to vector<8x32xbf16>
    %cst_41 = arith.constant dense<0.000000e+00> : vector<8x32xf32>
    %124 = tpu.matmul %120, %123, %cst_41 {dimension_numbers = #tpu.dot_dimension_numbers<[1], [0], [0], [1], [0, 0, 1, 1], [], []>} : vector<8x8xbf16>, vector<8x32xbf16>, vector<8x32xf32> -> vector<8x32xf32>
    %125 = arith.addf %103, %124 : vector<8x32xf32>
    %126 = vector.broadcast %29 : vector<1x32xf32> to vector<8x32xf32>
    %127 = arith.mulf %77, %126 : vector<8x32xf32>
    %128 = arith.truncf %127 : vector<8x32xf32> to vector<8x32xbf16>
    %cst_42 = arith.constant dense<0.000000e+00> : vector<8x8xf32>
    %129 = tpu.matmul %128, %80, %cst_42 {dimension_numbers = #tpu.dot_dimension_numbers<[1], [1], [0], [0], [0, 0, 1, 0], [], []>} : vector<8x32xbf16>, vector<8x32xbf16>, vector<8x8xf32> -> vector<8x8xf32>
    %130 = vector.broadcast %5 : vector<1x8xf32> to vector<8x8xf32>
    %131 = arith.addf %129, %130 : vector<8x8xf32>
    %cst_43 = arith.constant dense<0xFF800000> : vector<8xf32>
    %132 = vector.multi_reduction <maximumf>, %131, %cst_43 [1] : vector<8x8xf32> to vector<8xf32>
    %133 = vector.shape_cast %132 : vector<8xf32> to vector<8x1xf32>
    %134 = vector.broadcast %133 : vector<8x1xf32> to vector<8x8xf32>
    %135 = arith.subf %131, %134 : vector<8x8xf32>
    %136 = math.exp %135 : vector<8x8xf32>
    %cst_44 = arith.constant dense<0.000000e+00> : vector<8xf32>
    %137 = vector.multi_reduction <add>, %136, %cst_44 [1] : vector<8x8xf32> to vector<8xf32>
    %138 = vector.shape_cast %137 : vector<8xf32> to vector<8x1xf32>
    %139 = tpu.reciprocal %138 {approx = true} : vector<8x1xf32> -> vector<8x1xf32>
    %140 = vector.broadcast %139 : vector<8x1xf32> to vector<8x8xf32>
    %141 = arith.mulf %136, %140 : vector<8x8xf32>
    %142 = arith.truncf %141 : vector<8x8xf32> to vector<8x8xbf16>
    %143 = vector.broadcast %29 : vector<1x32xf32> to vector<8x32xf32>
    %144 = arith.mulf %79, %143 : vector<8x32xf32>
    %145 = arith.truncf %144 : vector<8x32xf32> to vector<8x32xbf16>
    %cst_45 = arith.constant dense<0.000000e+00> : vector<8x32xf32>
    %146 = tpu.matmul %142, %145, %cst_45 {dimension_numbers = #tpu.dot_dimension_numbers<[1], [0], [0], [1], [0, 0, 1, 1], [], []>} : vector<8x8xbf16>, vector<8x32xbf16>, vector<8x32xf32> -> vector<8x32xf32>
    %147 = arith.addf %125, %146 : vector<8x32xf32>
    %148 = vector.broadcast %36 : vector<1x32xf32> to vector<8x32xf32>
    %149 = arith.mulf %77, %148 : vector<8x32xf32>
    %150 = arith.truncf %149 : vector<8x32xf32> to vector<8x32xbf16>
    %cst_46 = arith.constant dense<0.000000e+00> : vector<8x8xf32>
    %151 = tpu.matmul %150, %80, %cst_46 {dimension_numbers = #tpu.dot_dimension_numbers<[1], [1], [0], [0], [0, 0, 1, 0], [], []>} : vector<8x32xbf16>, vector<8x32xbf16>, vector<8x8xf32> -> vector<8x8xf32>
    %152 = vector.broadcast %5 : vector<1x8xf32> to vector<8x8xf32>
    %153 = arith.addf %151, %152 : vector<8x8xf32>
    %cst_47 = arith.constant dense<0xFF800000> : vector<8xf32>
    %154 = vector.multi_reduction <maximumf>, %153, %cst_47 [1] : vector<8x8xf32> to vector<8xf32>
    %155 = vector.shape_cast %154 : vector<8xf32> to vector<8x1xf32>
    %156 = vector.broadcast %155 : vector<8x1xf32> to vector<8x8xf32>
    %157 = arith.subf %153, %156 : vector<8x8xf32>
    %158 = math.exp %157 : vector<8x8xf32>
    %cst_48 = arith.constant dense<0.000000e+00> : vector<8xf32>
    %159 = vector.multi_reduction <add>, %158, %cst_48 [1] : vector<8x8xf32> to vector<8xf32>
    %160 = vector.shape_cast %159 : vector<8xf32> to vector<8x1xf32>
    %161 = tpu.reciprocal %160 {approx = true} : vector<8x1xf32> -> vector<8x1xf32>
    %162 = vector.broadcast %161 : vector<8x1xf32> to vector<8x8xf32>
    %163 = arith.mulf %158, %162 : vector<8x8xf32>
    %164 = arith.truncf %163 : vector<8x8xf32> to vector<8x8xbf16>
    %165 = vector.broadcast %36 : vector<1x32xf32> to vector<8x32xf32>
    %166 = arith.mulf %79, %165 : vector<8x32xf32>
    %167 = arith.truncf %166 : vector<8x32xf32> to vector<8x32xbf16>
    %cst_49 = arith.constant dense<0.000000e+00> : vector<8x32xf32>
    %168 = tpu.matmul %164, %167, %cst_49 {dimension_numbers = #tpu.dot_dimension_numbers<[1], [0], [0], [1], [0, 0, 1, 1], [], []>} : vector<8x8xbf16>, vector<8x32xbf16>, vector<8x32xf32> -> vector<8x32xf32>
    %169 = arith.addf %147, %168 : vector<8x32xf32>
    %170 = arith.truncf %169 : vector<8x32xf32> to vector<8x32xbf16>
    %c0_50 = arith.constant 0 : index
    %c0_51 = arith.constant 0 : index
    %c0_52 = arith.constant 0 : index
    %171 = vector.load %arg9[%c0_50, %c0_51, %c0_52] : memref<2x32x32xbf16, #tpu.memory_space<vmem>>, vector<1x32x32xbf16>
    %172 = vector.shape_cast %171 : vector<1x32x32xbf16> to vector<32x32xbf16>
    %cst_53 = arith.constant dense<0.000000e+00> : vector<8x32xf32>
    %173 = tpu.matmul %170, %172, %cst_53 {dimension_numbers = #tpu.dot_dimension_numbers<[1], [0], [0], [1], [0, 0, 1, 1], [], []>} : vector<8x32xbf16>, vector<32x32xbf16>, vector<8x32xf32> -> vector<8x32xf32>
    %c0_54 = arith.constant 0 : index
    %c0_55 = arith.constant 0 : index
    %c0_56 = arith.constant 0 : index
    %174 = vector.load %arg10[%c0_54, %c0_55, %c0_56] : memref<2x1x32xf32, #tpu.memory_space<vmem>>, vector<1x1x32xf32>
    %175 = vector.shape_cast %174 : vector<1x1x32xf32> to vector<1x32xf32>
    %176 = vector.broadcast %175 : vector<1x32xf32> to vector<8x32xf32>
    %177 = arith.addf %173, %176 : vector<8x32xf32>
    %178 = arith.addf %62, %177 : vector<8x32xf32>
    %c0_57 = arith.constant 0 : index
    %c0_58 = arith.constant 0 : index
    %c0_59 = arith.constant 0 : index
    %179 = vector.load %arg11[%c0_57, %c0_58, %c0_59] : memref<2x1x32xf32, #tpu.memory_space<vmem>>, vector<1x1x32xf32>
    %180 = vector.shape_cast %179 : vector<1x1x32xf32> to vector<1x32xf32>
    %c0_60 = arith.constant 0 : index
    %c0_61 = arith.constant 0 : index
    %c0_62 = arith.constant 0 : index
    %181 = vector.load %arg12[%c0_60, %c0_61, %c0_62] : memref<2x1x32xf32, #tpu.memory_space<vmem>>, vector<1x1x32xf32>
    %182 = vector.shape_cast %181 : vector<1x1x32xf32> to vector<1x32xf32>
    %cst_63 = arith.constant dense<0.000000e+00> : vector<8xf32>
    %183 = vector.multi_reduction <add>, %178, %cst_63 [1] : vector<8x32xf32> to vector<8xf32>
    %184 = vector.shape_cast %183 : vector<8xf32> to vector<8x1xf32>
    %cst_64 = arith.constant 3.200000e+01 : f32
    %185 = vector.broadcast %cst_64 : f32 to vector<8x1xf32>
    %186 = arith.divf %184, %185 : vector<8x1xf32>
    %187 = vector.broadcast %186 : vector<8x1xf32> to vector<8x32xf32>
    %188 = arith.subf %178, %187 : vector<8x32xf32>
    %189 = arith.mulf %188, %188 : vector<8x32xf32>
    %cst_65 = arith.constant dense<0.000000e+00> : vector<8xf32>
    %190 = vector.multi_reduction <add>, %189, %cst_65 [1] : vector<8x32xf32> to vector<8xf32>
    %191 = vector.shape_cast %190 : vector<8xf32> to vector<8x1xf32>
    %cst_66 = arith.constant 3.200000e+01 : f32
    %192 = vector.broadcast %cst_66 : f32 to vector<8x1xf32>
    %193 = arith.divf %191, %192 : vector<8x1xf32>
    %194 = vector.broadcast %186 : vector<8x1xf32> to vector<8x32xf32>
    %195 = arith.subf %178, %194 : vector<8x32xf32>
    %cst_67 = arith.constant 1.000000e-07 : f32
    %196 = vector.broadcast %cst_67 : f32 to vector<8x1xf32>
    %197 = arith.addf %193, %196 : vector<8x1xf32>
    %198 = math.rsqrt %197 : vector<8x1xf32>
    %199 = vector.broadcast %198 : vector<8x1xf32> to vector<8x32xf32>
    %200 = arith.mulf %195, %199 : vector<8x32xf32>
    %201 = vector.broadcast %180 : vector<1x32xf32> to vector<8x32xf32>
    %202 = arith.mulf %200, %201 : vector<8x32xf32>
    %203 = vector.broadcast %182 : vector<1x32xf32> to vector<8x32xf32>
    %204 = arith.addf %202, %203 : vector<8x32xf32>
    %205 = arith.truncf %204 : vector<8x32xf32> to vector<8x32xbf16>
    %c0_68 = arith.constant 0 : index
    %c0_69 = arith.constant 0 : index
    %c0_70 = arith.constant 0 : index
    %206 = vector.load %arg13[%c0_68, %c0_69, %c0_70] : memref<2x32x64xbf16, #tpu.memory_space<vmem>>, vector<1x32x64xbf16>
    %207 = vector.shape_cast %206 : vector<1x32x64xbf16> to vector<32x64xbf16>
    %cst_71 = arith.constant dense<0.000000e+00> : vector<8x64xf32>
    %208 = tpu.matmul %205, %207, %cst_71 {dimension_numbers = #tpu.dot_dimension_numbers<[1], [0], [0], [1], [0, 0, 1, 1], [], []>} : vector<8x32xbf16>, vector<32x64xbf16>, vector<8x64xf32> -> vector<8x64xf32>
    %c0_72 = arith.constant 0 : index
    %c0_73 = arith.constant 0 : index
    %c0_74 = arith.constant 0 : index
    %209 = vector.load %arg14[%c0_72, %c0_73, %c0_74] : memref<2x1x64xf32, #tpu.memory_space<vmem>>, vector<1x1x64xf32>
    %210 = vector.shape_cast %209 : vector<1x1x64xf32> to vector<1x64xf32>
    %211 = vector.broadcast %210 : vector<1x64xf32> to vector<8x64xf32>
    %212 = arith.addf %208, %211 : vector<8x64xf32>
    %213 = arith.mulf %212, %212 : vector<8x64xf32>
    %214 = arith.mulf %212, %213 : vector<8x64xf32>
    %cst_75 = arith.constant 4.471500e-02 : f32
    %215 = vector.broadcast %cst_75 : f32 to vector<8x64xf32>
    %216 = arith.mulf %215, %214 : vector<8x64xf32>
    %217 = arith.addf %212, %216 : vector<8x64xf32>
    %cst_76 = arith.constant 0.797884583 : f32
    %218 = vector.broadcast %cst_76 : f32 to vector<8x64xf32>
    %219 = arith.mulf %218, %217 : vector<8x64xf32>
    %220 = math.tanh %219 : vector<8x64xf32>
    %cst_77 = arith.constant 1.000000e+00 : f32
    %221 = vector.broadcast %cst_77 : f32 to vector<8x64xf32>
    %222 = arith.addf %221, %220 : vector<8x64xf32>
    %cst_78 = arith.constant 5.000000e-01 : f32
    %223 = vector.broadcast %cst_78 : f32 to vector<8x64xf32>
    %224 = arith.mulf %223, %222 : vector<8x64xf32>
    %225 = arith.mulf %212, %224 : vector<8x64xf32>
    %226 = arith.truncf %225 : vector<8x64xf32> to vector<8x64xbf16>
    %c0_79 = arith.constant 0 : index
    %c0_80 = arith.constant 0 : index
    %c0_81 = arith.constant 0 : index
    %227 = vector.load %arg15[%c0_79, %c0_80, %c0_81] : memref<2x64x32xbf16, #tpu.memory_space<vmem>>, vector<1x64x32xbf16>
    %228 = vector.shape_cast %227 : vector<1x64x32xbf16> to vector<64x32xbf16>
    %cst_82 = arith.constant dense<0.000000e+00> : vector<8x32xf32>
    %229 = tpu.matmul %226, %228, %cst_82 {dimension_numbers = #tpu.dot_dimension_numbers<[1], [0], [0], [1], [0, 0, 1, 1], [], []>} : vector<8x64xbf16>, vector<64x32xbf16>, vector<8x32xf32> -> vector<8x32xf32>
    %c0_83 = arith.constant 0 : index
    %c0_84 = arith.constant 0 : index
    %c0_85 = arith.constant 0 : index
    %230 = vector.load %arg16[%c0_83, %c0_84, %c0_85] : memref<2x1x32xf32, #tpu.memory_space<vmem>>, vector<1x1x32xf32>
    %231 = vector.shape_cast %230 : vector<1x1x32xf32> to vector<1x32xf32>
    %232 = vector.broadcast %231 : vector<1x32xf32> to vector<8x32xf32>
    %233 = arith.addf %229, %232 : vector<8x32xf32>
    %234 = arith.addf %204, %233 : vector<8x32xf32>
    %c0_86 = arith.constant 0 : index
    %c0_87 = arith.constant 0 : index
    %c0_88 = arith.constant 0 : index
    %235 = vector.load %arg17[%c0_86, %c0_87, %c0_88] : memref<2x1x32xf32, #tpu.memory_space<vmem>>, vector<1x1x32xf32>
    %236 = vector.shape_cast %235 : vector<1x1x32xf32> to vector<1x32xf32>
    %c0_89 = arith.constant 0 : index
    %c0_90 = arith.constant 0 : index
    %c0_91 = arith.constant 0 : index
    %237 = vector.load %arg18[%c0_89, %c0_90, %c0_91] : memref<2x1x32xf32, #tpu.memory_space<vmem>>, vector<1x1x32xf32>
    %238 = vector.shape_cast %237 : vector<1x1x32xf32> to vector<1x32xf32>
    %cst_92 = arith.constant dense<0.000000e+00> : vector<8xf32>
    %239 = vector.multi_reduction <add>, %234, %cst_92 [1] : vector<8x32xf32> to vector<8xf32>
    %240 = vector.shape_cast %239 : vector<8xf32> to vector<8x1xf32>
    %cst_93 = arith.constant 3.200000e+01 : f32
    %241 = vector.broadcast %cst_93 : f32 to vector<8x1xf32>
    %242 = arith.divf %240, %241 : vector<8x1xf32>
    %243 = vector.broadcast %242 : vector<8x1xf32> to vector<8x32xf32>
    %244 = arith.subf %234, %243 : vector<8x32xf32>
    %245 = arith.mulf %244, %244 : vector<8x32xf32>
    %cst_94 = arith.constant dense<0.000000e+00> : vector<8xf32>
    %246 = vector.multi_reduction <add>, %245, %cst_94 [1] : vector<8x32xf32> to vector<8xf32>
    %247 = vector.shape_cast %246 : vector<8xf32> to vector<8x1xf32>
    %cst_95 = arith.constant 3.200000e+01 : f32
    %248 = vector.broadcast %cst_95 : f32 to vector<8x1xf32>
    %249 = arith.divf %247, %248 : vector<8x1xf32>
    %250 = vector.broadcast %242 : vector<8x1xf32> to vector<8x32xf32>
    %251 = arith.subf %234, %250 : vector<8x32xf32>
    %cst_96 = arith.constant 1.000000e-07 : f32
    %252 = vector.broadcast %cst_96 : f32 to vector<8x1xf32>
    %253 = arith.addf %249, %252 : vector<8x1xf32>
    %254 = math.rsqrt %253 : vector<8x1xf32>
    %255 = vector.broadcast %254 : vector<8x1xf32> to vector<8x32xf32>
    %256 = arith.mulf %251, %255 : vector<8x32xf32>
    %257 = vector.broadcast %236 : vector<1x32xf32> to vector<8x32xf32>
    %258 = arith.mulf %256, %257 : vector<8x32xf32>
    %259 = vector.broadcast %238 : vector<1x32xf32> to vector<8x32xf32>
    %260 = arith.addf %258, %259 : vector<8x32xf32>
    %261 = arith.truncf %260 : vector<8x32xf32> to vector<8x32xbf16>
    %cst_97 = arith.constant dense<0.000000e+00> : vector<8x16xf32>
    %262 = tpu.matmul %261, %63, %cst_97 {dimension_numbers = #tpu.dot_dimension_numbers<[1], [0], [0], [1], [0, 0, 1, 1], [], []>} : vector<8x32xbf16>, vector<32x16xbf16>, vector<8x16xf32> -> vector<8x16xf32>
    %263 = vector.broadcast %64 : vector<1x16xf32> to vector<8x16xf32>
    %264 = arith.addf %262, %263 : vector<8x16xf32>
    %265 = arith.truncf %260 : vector<8x32xf32> to vector<8x32xbf16>
    %c1 = arith.constant 1 : index
    %c0_98 = arith.constant 0 : index
    %c0_99 = arith.constant 0 : index
    %266 = vector.load %arg7[%c1, %c0_98, %c0_99] : memref<2x32x96xbf16, #tpu.memory_space<vmem>>, vector<1x32x96xbf16>
    %267 = vector.shape_cast %266 : vector<1x32x96xbf16> to vector<32x96xbf16>
    %cst_100 = arith.constant dense<0.000000e+00> : vector<8x96xf32>
    %268 = tpu.matmul %265, %267, %cst_100 {dimension_numbers = #tpu.dot_dimension_numbers<[1], [0], [0], [1], [0, 0, 1, 1], [], []>} : vector<8x32xbf16>, vector<32x96xbf16>, vector<8x96xf32> -> vector<8x96xf32>
    %c1_101 = arith.constant 1 : index
    %c0_102 = arith.constant 0 : index
    %c0_103 = arith.constant 0 : index
    %269 = vector.load %arg8[%c1_101, %c0_102, %c0_103] : memref<2x1x96xf32, #tpu.memory_space<vmem>>, vector<1x1x96xf32>
    %270 = vector.shape_cast %269 : vector<1x1x96xf32> to vector<1x96xf32>
    %271 = vector.broadcast %270 : vector<1x96xf32> to vector<8x96xf32>
    %272 = arith.addf %268, %271 : vector<8x96xf32>
    %273 = vector.extract_strided_slice %272 {offsets = [0, 0], sizes = [8, 32], strides = [1, 1]} : vector<8x96xf32> to vector<8x32xf32>
    %274 = vector.extract_strided_slice %272 {offsets = [0, 32], sizes = [8, 32], strides = [1, 1]} : vector<8x96xf32> to vector<8x32xf32>
    %275 = vector.extract_strided_slice %272 {offsets = [0, 64], sizes = [8, 32], strides = [1, 1]} : vector<8x96xf32> to vector<8x32xf32>
    %276 = arith.truncf %274 : vector<8x32xf32> to vector<8x32xbf16>
    %cst_104 = arith.constant 0.000000e+00 : f32
    %277 = vector.broadcast %cst_104 : f32 to vector<8x32xf32>
    %278 = vector.broadcast %15 : vector<1x32xf32> to vector<8x32xf32>
    %279 = arith.mulf %273, %278 : vector<8x32xf32>
    %280 = arith.truncf %279 : vector<8x32xf32> to vector<8x32xbf16>
    %cst_105 = arith.constant dense<0.000000e+00> : vector<8x8xf32>
    %281 = tpu.matmul %280, %276, %cst_105 {dimension_numbers = #tpu.dot_dimension_numbers<[1], [1], [0], [0], [0, 0, 1, 0], [], []>} : vector<8x32xbf16>, vector<8x32xbf16>, vector<8x8xf32> -> vector<8x8xf32>
    %282 = vector.broadcast %5 : vector<1x8xf32> to vector<8x8xf32>
    %283 = arith.addf %281, %282 : vector<8x8xf32>
    %cst_106 = arith.constant dense<0xFF800000> : vector<8xf32>
    %284 = vector.multi_reduction <maximumf>, %283, %cst_106 [1] : vector<8x8xf32> to vector<8xf32>
    %285 = vector.shape_cast %284 : vector<8xf32> to vector<8x1xf32>
    %286 = vector.broadcast %285 : vector<8x1xf32> to vector<8x8xf32>
    %287 = arith.subf %283, %286 : vector<8x8xf32>
    %288 = math.exp %287 : vector<8x8xf32>
    %cst_107 = arith.constant dense<0.000000e+00> : vector<8xf32>
    %289 = vector.multi_reduction <add>, %288, %cst_107 [1] : vector<8x8xf32> to vector<8xf32>
    %290 = vector.shape_cast %289 : vector<8xf32> to vector<8x1xf32>
    %291 = tpu.reciprocal %290 {approx = true} : vector<8x1xf32> -> vector<8x1xf32>
    %292 = vector.broadcast %291 : vector<8x1xf32> to vector<8x8xf32>
    %293 = arith.mulf %288, %292 : vector<8x8xf32>
    %294 = arith.truncf %293 : vector<8x8xf32> to vector<8x8xbf16>
    %295 = vector.broadcast %15 : vector<1x32xf32> to vector<8x32xf32>
    %296 = arith.mulf %275, %295 : vector<8x32xf32>
    %297 = arith.truncf %296 : vector<8x32xf32> to vector<8x32xbf16>
    %cst_108 = arith.constant dense<0.000000e+00> : vector<8x32xf32>
    %298 = tpu.matmul %294, %297, %cst_108 {dimension_numbers = #tpu.dot_dimension_numbers<[1], [0], [0], [1], [0, 0, 1, 1], [], []>} : vector<8x8xbf16>, vector<8x32xbf16>, vector<8x32xf32> -> vector<8x32xf32>
    %299 = arith.addf %277, %298 : vector<8x32xf32>
    %300 = vector.broadcast %22 : vector<1x32xf32> to vector<8x32xf32>
    %301 = arith.mulf %273, %300 : vector<8x32xf32>
    %302 = arith.truncf %301 : vector<8x32xf32> to vector<8x32xbf16>
    %cst_109 = arith.constant dense<0.000000e+00> : vector<8x8xf32>
    %303 = tpu.matmul %302, %276, %cst_109 {dimension_numbers = #tpu.dot_dimension_numbers<[1], [1], [0], [0], [0, 0, 1, 0], [], []>} : vector<8x32xbf16>, vector<8x32xbf16>, vector<8x8xf32> -> vector<8x8xf32>
    %304 = vector.broadcast %5 : vector<1x8xf32> to vector<8x8xf32>
    %305 = arith.addf %303, %304 : vector<8x8xf32>
    %cst_110 = arith.constant dense<0xFF800000> : vector<8xf32>
    %306 = vector.multi_reduction <maximumf>, %305, %cst_110 [1] : vector<8x8xf32> to vector<8xf32>
    %307 = vector.shape_cast %306 : vector<8xf32> to vector<8x1xf32>
    %308 = vector.broadcast %307 : vector<8x1xf32> to vector<8x8xf32>
    %309 = arith.subf %305, %308 : vector<8x8xf32>
    %310 = math.exp %309 : vector<8x8xf32>
    %cst_111 = arith.constant dense<0.000000e+00> : vector<8xf32>
    %311 = vector.multi_reduction <add>, %310, %cst_111 [1] : vector<8x8xf32> to vector<8xf32>
    %312 = vector.shape_cast %311 : vector<8xf32> to vector<8x1xf32>
    %313 = tpu.reciprocal %312 {approx = true} : vector<8x1xf32> -> vector<8x1xf32>
    %314 = vector.broadcast %313 : vector<8x1xf32> to vector<8x8xf32>
    %315 = arith.mulf %310, %314 : vector<8x8xf32>
    %316 = arith.truncf %315 : vector<8x8xf32> to vector<8x8xbf16>
    %317 = vector.broadcast %22 : vector<1x32xf32> to vector<8x32xf32>
    %318 = arith.mulf %275, %317 : vector<8x32xf32>
    %319 = arith.truncf %318 : vector<8x32xf32> to vector<8x32xbf16>
    %cst_112 = arith.constant dense<0.000000e+00> : vector<8x32xf32>
    %320 = tpu.matmul %316, %319, %cst_112 {dimension_numbers = #tpu.dot_dimension_numbers<[1], [0], [0], [1], [0, 0, 1, 1], [], []>} : vector<8x8xbf16>, vector<8x32xbf16>, vector<8x32xf32> -> vector<8x32xf32>
    %321 = arith.addf %299, %320 : vector<8x32xf32>
    %322 = vector.broadcast %29 : vector<1x32xf32> to vector<8x32xf32>
    %323 = arith.mulf %273, %322 : vector<8x32xf32>
    %324 = arith.truncf %323 : vector<8x32xf32> to vector<8x32xbf16>
    %cst_113 = arith.constant dense<0.000000e+00> : vector<8x8xf32>
    %325 = tpu.matmul %324, %276, %cst_113 {dimension_numbers = #tpu.dot_dimension_numbers<[1], [1], [0], [0], [0, 0, 1, 0], [], []>} : vector<8x32xbf16>, vector<8x32xbf16>, vector<8x8xf32> -> vector<8x8xf32>
    %326 = vector.broadcast %5 : vector<1x8xf32> to vector<8x8xf32>
    %327 = arith.addf %325, %326 : vector<8x8xf32>
    %cst_114 = arith.constant dense<0xFF800000> : vector<8xf32>
    %328 = vector.multi_reduction <maximumf>, %327, %cst_114 [1] : vector<8x8xf32> to vector<8xf32>
    %329 = vector.shape_cast %328 : vector<8xf32> to vector<8x1xf32>
    %330 = vector.broadcast %329 : vector<8x1xf32> to vector<8x8xf32>
    %331 = arith.subf %327, %330 : vector<8x8xf32>
    %332 = math.exp %331 : vector<8x8xf32>
    %cst_115 = arith.constant dense<0.000000e+00> : vector<8xf32>
    %333 = vector.multi_reduction <add>, %332, %cst_115 [1] : vector<8x8xf32> to vector<8xf32>
    %334 = vector.shape_cast %333 : vector<8xf32> to vector<8x1xf32>
    %335 = tpu.reciprocal %334 {approx = true} : vector<8x1xf32> -> vector<8x1xf32>
    %336 = vector.broadcast %335 : vector<8x1xf32> to vector<8x8xf32>
    %337 = arith.mulf %332, %336 : vector<8x8xf32>
    %338 = arith.truncf %337 : vector<8x8xf32> to vector<8x8xbf16>
    %339 = vector.broadcast %29 : vector<1x32xf32> to vector<8x32xf32>
    %340 = arith.mulf %275, %339 : vector<8x32xf32>
    %341 = arith.truncf %340 : vector<8x32xf32> to vector<8x32xbf16>
    %cst_116 = arith.constant dense<0.000000e+00> : vector<8x32xf32>
    %342 = tpu.matmul %338, %341, %cst_116 {dimension_numbers = #tpu.dot_dimension_numbers<[1], [0], [0], [1], [0, 0, 1, 1], [], []>} : vector<8x8xbf16>, vector<8x32xbf16>, vector<8x32xf32> -> vector<8x32xf32>
    %343 = arith.addf %321, %342 : vector<8x32xf32>
    %344 = vector.broadcast %36 : vector<1x32xf32> to vector<8x32xf32>
    %345 = arith.mulf %273, %344 : vector<8x32xf32>
    %346 = arith.truncf %345 : vector<8x32xf32> to vector<8x32xbf16>
    %cst_117 = arith.constant dense<0.000000e+00> : vector<8x8xf32>
    %347 = tpu.matmul %346, %276, %cst_117 {dimension_numbers = #tpu.dot_dimension_numbers<[1], [1], [0], [0], [0, 0, 1, 0], [], []>} : vector<8x32xbf16>, vector<8x32xbf16>, vector<8x8xf32> -> vector<8x8xf32>
    %348 = vector.broadcast %5 : vector<1x8xf32> to vector<8x8xf32>
    %349 = arith.addf %347, %348 : vector<8x8xf32>
    %cst_118 = arith.constant dense<0xFF800000> : vector<8xf32>
    %350 = vector.multi_reduction <maximumf>, %349, %cst_118 [1] : vector<8x8xf32> to vector<8xf32>
    %351 = vector.shape_cast %350 : vector<8xf32> to vector<8x1xf32>
    %352 = vector.broadcast %351 : vector<8x1xf32> to vector<8x8xf32>
    %353 = arith.subf %349, %352 : vector<8x8xf32>
    %354 = math.exp %353 : vector<8x8xf32>
    %cst_119 = arith.constant dense<0.000000e+00> : vector<8xf32>
    %355 = vector.multi_reduction <add>, %354, %cst_119 [1] : vector<8x8xf32> to vector<8xf32>
    %356 = vector.shape_cast %355 : vector<8xf32> to vector<8x1xf32>
    %357 = tpu.reciprocal %356 {approx = true} : vector<8x1xf32> -> vector<8x1xf32>
    %358 = vector.broadcast %357 : vector<8x1xf32> to vector<8x8xf32>
    %359 = arith.mulf %354, %358 : vector<8x8xf32>
    %360 = arith.truncf %359 : vector<8x8xf32> to vector<8x8xbf16>
    %361 = vector.broadcast %36 : vector<1x32xf32> to vector<8x32xf32>
    %362 = arith.mulf %275, %361 : vector<8x32xf32>
    %363 = arith.truncf %362 : vector<8x32xf32> to vector<8x32xbf16>
    %cst_120 = arith.constant dense<0.000000e+00> : vector<8x32xf32>
    %364 = tpu.matmul %360, %363, %cst_120 {dimension_numbers = #tpu.dot_dimension_numbers<[1], [0], [0], [1], [0, 0, 1, 1], [], []>} : vector<8x8xbf16>, vector<8x32xbf16>, vector<8x32xf32> -> vector<8x32xf32>
    %365 = arith.addf %343, %364 : vector<8x32xf32>
    %366 = arith.truncf %365 : vector<8x32xf32> to vector<8x32xbf16>
    %c1_121 = arith.constant 1 : index
    %c0_122 = arith.constant 0 : index
    %c0_123 = arith.constant 0 : index
    %367 = vector.load %arg9[%c1_121, %c0_122, %c0_123] : memref<2x32x32xbf16, #tpu.memory_space<vmem>>, vector<1x32x32xbf16>
    %368 = vector.shape_cast %367 : vector<1x32x32xbf16> to vector<32x32xbf16>
    %cst_124 = arith.constant dense<0.000000e+00> : vector<8x32xf32>
    %369 = tpu.matmul %366, %368, %cst_124 {dimension_numbers = #tpu.dot_dimension_numbers<[1], [0], [0], [1], [0, 0, 1, 1], [], []>} : vector<8x32xbf16>, vector<32x32xbf16>, vector<8x32xf32> -> vector<8x32xf32>
    %c1_125 = arith.constant 1 : index
    %c0_126 = arith.constant 0 : index
    %c0_127 = arith.constant 0 : index
    %370 = vector.load %arg10[%c1_125, %c0_126, %c0_127] : memref<2x1x32xf32, #tpu.memory_space<vmem>>, vector<1x1x32xf32>
    %371 = vector.shape_cast %370 : vector<1x1x32xf32> to vector<1x32xf32>
    %372 = vector.broadcast %371 : vector<1x32xf32> to vector<8x32xf32>
    %373 = arith.addf %369, %372 : vector<8x32xf32>
    %374 = arith.addf %260, %373 : vector<8x32xf32>
    %c1_128 = arith.constant 1 : index
    %c0_129 = arith.constant 0 : index
    %c0_130 = arith.constant 0 : index
    %375 = vector.load %arg11[%c1_128, %c0_129, %c0_130] : memref<2x1x32xf32, #tpu.memory_space<vmem>>, vector<1x1x32xf32>
    %376 = vector.shape_cast %375 : vector<1x1x32xf32> to vector<1x32xf32>
    %c1_131 = arith.constant 1 : index
    %c0_132 = arith.constant 0 : index
    %c0_133 = arith.constant 0 : index
    %377 = vector.load %arg12[%c1_131, %c0_132, %c0_133] : memref<2x1x32xf32, #tpu.memory_space<vmem>>, vector<1x1x32xf32>
    %378 = vector.shape_cast %377 : vector<1x1x32xf32> to vector<1x32xf32>
    %cst_134 = arith.constant dense<0.000000e+00> : vector<8xf32>
    %379 = vector.multi_reduction <add>, %374, %cst_134 [1] : vector<8x32xf32> to vector<8xf32>
    %380 = vector.shape_cast %379 : vector<8xf32> to vector<8x1xf32>
    %cst_135 = arith.constant 3.200000e+01 : f32
    %381 = vector.broadcast %cst_135 : f32 to vector<8x1xf32>
    %382 = arith.divf %380, %381 : vector<8x1xf32>
    %383 = vector.broadcast %382 : vector<8x1xf32> to vector<8x32xf32>
    %384 = arith.subf %374, %383 : vector<8x32xf32>
    %385 = arith.mulf %384, %384 : vector<8x32xf32>
    %cst_136 = arith.constant dense<0.000000e+00> : vector<8xf32>
    %386 = vector.multi_reduction <add>, %385, %cst_136 [1] : vector<8x32xf32> to vector<8xf32>
    %387 = vector.shape_cast %386 : vector<8xf32> to vector<8x1xf32>
    %cst_137 = arith.constant 3.200000e+01 : f32
    %388 = vector.broadcast %cst_137 : f32 to vector<8x1xf32>
    %389 = arith.divf %387, %388 : vector<8x1xf32>
    %390 = vector.broadcast %382 : vector<8x1xf32> to vector<8x32xf32>
    %391 = arith.subf %374, %390 : vector<8x32xf32>
    %cst_138 = arith.constant 1.000000e-07 : f32
    %392 = vector.broadcast %cst_138 : f32 to vector<8x1xf32>
    %393 = arith.addf %389, %392 : vector<8x1xf32>
    %394 = math.rsqrt %393 : vector<8x1xf32>
    %395 = vector.broadcast %394 : vector<8x1xf32> to vector<8x32xf32>
    %396 = arith.mulf %391, %395 : vector<8x32xf32>
    %397 = vector.broadcast %376 : vector<1x32xf32> to vector<8x32xf32>
    %398 = arith.mulf %396, %397 : vector<8x32xf32>
    %399 = vector.broadcast %378 : vector<1x32xf32> to vector<8x32xf32>
    %400 = arith.addf %398, %399 : vector<8x32xf32>
    %401 = arith.truncf %400 : vector<8x32xf32> to vector<8x32xbf16>
    %c1_139 = arith.constant 1 : index
    %c0_140 = arith.constant 0 : index
    %c0_141 = arith.constant 0 : index
    %402 = vector.load %arg13[%c1_139, %c0_140, %c0_141] : memref<2x32x64xbf16, #tpu.memory_space<vmem>>, vector<1x32x64xbf16>
    %403 = vector.shape_cast %402 : vector<1x32x64xbf16> to vector<32x64xbf16>
    %cst_142 = arith.constant dense<0.000000e+00> : vector<8x64xf32>
    %404 = tpu.matmul %401, %403, %cst_142 {dimension_numbers = #tpu.dot_dimension_numbers<[1], [0], [0], [1], [0, 0, 1, 1], [], []>} : vector<8x32xbf16>, vector<32x64xbf16>, vector<8x64xf32> -> vector<8x64xf32>
    %c1_143 = arith.constant 1 : index
    %c0_144 = arith.constant 0 : index
    %c0_145 = arith.constant 0 : index
    %405 = vector.load %arg14[%c1_143, %c0_144, %c0_145] : memref<2x1x64xf32, #tpu.memory_space<vmem>>, vector<1x1x64xf32>
    %406 = vector.shape_cast %405 : vector<1x1x64xf32> to vector<1x64xf32>
    %407 = vector.broadcast %406 : vector<1x64xf32> to vector<8x64xf32>
    %408 = arith.addf %404, %407 : vector<8x64xf32>
    %409 = arith.mulf %408, %408 : vector<8x64xf32>
    %410 = arith.mulf %408, %409 : vector<8x64xf32>
    %cst_146 = arith.constant 4.471500e-02 : f32
    %411 = vector.broadcast %cst_146 : f32 to vector<8x64xf32>
    %412 = arith.mulf %411, %410 : vector<8x64xf32>
    %413 = arith.addf %408, %412 : vector<8x64xf32>
    %cst_147 = arith.constant 0.797884583 : f32
    %414 = vector.broadcast %cst_147 : f32 to vector<8x64xf32>
    %415 = arith.mulf %414, %413 : vector<8x64xf32>
    %416 = math.tanh %415 : vector<8x64xf32>
    %cst_148 = arith.constant 1.000000e+00 : f32
    %417 = vector.broadcast %cst_148 : f32 to vector<8x64xf32>
    %418 = arith.addf %417, %416 : vector<8x64xf32>
    %cst_149 = arith.constant 5.000000e-01 : f32
    %419 = vector.broadcast %cst_149 : f32 to vector<8x64xf32>
    %420 = arith.mulf %419, %418 : vector<8x64xf32>
    %421 = arith.mulf %408, %420 : vector<8x64xf32>
    %422 = arith.truncf %421 : vector<8x64xf32> to vector<8x64xbf16>
    %c1_150 = arith.constant 1 : index
    %c0_151 = arith.constant 0 : index
    %c0_152 = arith.constant 0 : index
    %423 = vector.load %arg15[%c1_150, %c0_151, %c0_152] : memref<2x64x32xbf16, #tpu.memory_space<vmem>>, vector<1x64x32xbf16>
    %424 = vector.shape_cast %423 : vector<1x64x32xbf16> to vector<64x32xbf16>
    %cst_153 = arith.constant dense<0.000000e+00> : vector<8x32xf32>
    %425 = tpu.matmul %422, %424, %cst_153 {dimension_numbers = #tpu.dot_dimension_numbers<[1], [0], [0], [1], [0, 0, 1, 1], [], []>} : vector<8x64xbf16>, vector<64x32xbf16>, vector<8x32xf32> -> vector<8x32xf32>
    %c1_154 = arith.constant 1 : index
    %c0_155 = arith.constant 0 : index
    %c0_156 = arith.constant 0 : index
    %426 = vector.load %arg16[%c1_154, %c0_155, %c0_156] : memref<2x1x32xf32, #tpu.memory_space<vmem>>, vector<1x1x32xf32>
    %427 = vector.shape_cast %426 : vector<1x1x32xf32> to vector<1x32xf32>
    %428 = vector.broadcast %427 : vector<1x32xf32> to vector<8x32xf32>
    %429 = arith.addf %425, %428 : vector<8x32xf32>
    %430 = arith.addf %400, %429 : vector<8x32xf32>
    %c1_157 = arith.constant 1 : index
    %c0_158 = arith.constant 0 : index
    %c0_159 = arith.constant 0 : index
    %431 = vector.load %arg17[%c1_157, %c0_158, %c0_159] : memref<2x1x32xf32, #tpu.memory_space<vmem>>, vector<1x1x32xf32>
    %432 = vector.shape_cast %431 : vector<1x1x32xf32> to vector<1x32xf32>
    %c1_160 = arith.constant 1 : index
    %c0_161 = arith.constant 0 : index
    %c0_162 = arith.constant 0 : index
    %433 = vector.load %arg18[%c1_160, %c0_161, %c0_162] : memref<2x1x32xf32, #tpu.memory_space<vmem>>, vector<1x1x32xf32>
    %434 = vector.shape_cast %433 : vector<1x1x32xf32> to vector<1x32xf32>
    %cst_163 = arith.constant dense<0.000000e+00> : vector<8xf32>
    %435 = vector.multi_reduction <add>, %430, %cst_163 [1] : vector<8x32xf32> to vector<8xf32>
    %436 = vector.shape_cast %435 : vector<8xf32> to vector<8x1xf32>
    %cst_164 = arith.constant 3.200000e+01 : f32
    %437 = vector.broadcast %cst_164 : f32 to vector<8x1xf32>
    %438 = arith.divf %436, %437 : vector<8x1xf32>
    %439 = vector.broadcast %438 : vector<8x1xf32> to vector<8x32xf32>
    %440 = arith.subf %430, %439 : vector<8x32xf32>
    %441 = arith.mulf %440, %440 : vector<8x32xf32>
    %cst_165 = arith.constant dense<0.000000e+00> : vector<8xf32>
    %442 = vector.multi_reduction <add>, %441, %cst_165 [1] : vector<8x32xf32> to vector<8xf32>
    %443 = vector.shape_cast %442 : vector<8xf32> to vector<8x1xf32>
    %cst_166 = arith.constant 3.200000e+01 : f32
    %444 = vector.broadcast %cst_166 : f32 to vector<8x1xf32>
    %445 = arith.divf %443, %444 : vector<8x1xf32>
    %446 = vector.broadcast %438 : vector<8x1xf32> to vector<8x32xf32>
    %447 = arith.subf %430, %446 : vector<8x32xf32>
    %cst_167 = arith.constant 1.000000e-07 : f32
    %448 = vector.broadcast %cst_167 : f32 to vector<8x1xf32>
    %449 = arith.addf %445, %448 : vector<8x1xf32>
    %450 = math.rsqrt %449 : vector<8x1xf32>
    %451 = vector.broadcast %450 : vector<8x1xf32> to vector<8x32xf32>
    %452 = arith.mulf %447, %451 : vector<8x32xf32>
    %453 = vector.broadcast %432 : vector<1x32xf32> to vector<8x32xf32>
    %454 = arith.mulf %452, %453 : vector<8x32xf32>
    %455 = vector.broadcast %434 : vector<1x32xf32> to vector<8x32xf32>
    %456 = arith.addf %454, %455 : vector<8x32xf32>
    %457 = arith.truncf %456 : vector<8x32xf32> to vector<8x32xbf16>
    %cst_168 = arith.constant dense<0.000000e+00> : vector<8x16xf32>
    %458 = tpu.matmul %457, %63, %cst_168 {dimension_numbers = #tpu.dot_dimension_numbers<[1], [0], [0], [1], [0, 0, 1, 1], [], []>} : vector<8x32xbf16>, vector<32x16xbf16>, vector<8x16xf32> -> vector<8x16xf32>
    %459 = vector.broadcast %64 : vector<1x16xf32> to vector<8x16xf32>
    %460 = arith.addf %458, %459 : vector<8x16xf32>
    %461 = arith.truncf %456 : vector<8x32xf32> to vector<8x32xbf16>
    %c0_169 = arith.constant 0 : index
    %c0_170 = arith.constant 0 : index
    %462 = vector.load %arg19[%c0_169, %c0_170] : memref<32x32xbf16, #tpu.memory_space<vmem>>, vector<32x32xbf16>
    %cst_171 = arith.constant dense<0.000000e+00> : vector<8x32xf32>
    %463 = tpu.matmul %461, %462, %cst_171 {dimension_numbers = #tpu.dot_dimension_numbers<[1], [0], [0], [1], [0, 0, 1, 1], [], []>} : vector<8x32xbf16>, vector<32x32xbf16>, vector<8x32xf32> -> vector<8x32xf32>
    %c0_172 = arith.constant 0 : index
    %c0_173 = arith.constant 0 : index
    %464 = vector.load %arg20[%c0_172, %c0_173] : memref<1x32xf32, #tpu.memory_space<vmem>>, vector<1x32xf32>
    %465 = vector.broadcast %464 : vector<1x32xf32> to vector<8x32xf32>
    %466 = arith.addf %463, %465 : vector<8x32xf32>
    %467 = arith.mulf %466, %466 : vector<8x32xf32>
    %468 = arith.mulf %466, %467 : vector<8x32xf32>
    %cst_174 = arith.constant 4.471500e-02 : f32
    %469 = vector.broadcast %cst_174 : f32 to vector<8x32xf32>
    %470 = arith.mulf %469, %468 : vector<8x32xf32>
    %471 = arith.addf %466, %470 : vector<8x32xf32>
    %cst_175 = arith.constant 0.797884583 : f32
    %472 = vector.broadcast %cst_175 : f32 to vector<8x32xf32>
    %473 = arith.mulf %472, %471 : vector<8x32xf32>
    %474 = math.tanh %473 : vector<8x32xf32>
    %cst_176 = arith.constant 1.000000e+00 : f32
    %475 = vector.broadcast %cst_176 : f32 to vector<8x32xf32>
    %476 = arith.addf %475, %474 : vector<8x32xf32>
    %cst_177 = arith.constant 5.000000e-01 : f32
    %477 = vector.broadcast %cst_177 : f32 to vector<8x32xf32>
    %478 = arith.mulf %477, %476 : vector<8x32xf32>
    %479 = arith.mulf %466, %478 : vector<8x32xf32>
    %c0_178 = arith.constant 0 : index
    %c0_179 = arith.constant 0 : index
    %480 = vector.load %arg21[%c0_178, %c0_179] : memref<1x32xf32, #tpu.memory_space<vmem>>, vector<1x32xf32>
    %c0_180 = arith.constant 0 : index
    %c0_181 = arith.constant 0 : index
    %481 = vector.load %arg22[%c0_180, %c0_181] : memref<1x32xf32, #tpu.memory_space<vmem>>, vector<1x32xf32>
    %cst_182 = arith.constant dense<0.000000e+00> : vector<8xf32>
    %482 = vector.multi_reduction <add>, %479, %cst_182 [1] : vector<8x32xf32> to vector<8xf32>
    %483 = vector.shape_cast %482 : vector<8xf32> to vector<8x1xf32>
    %cst_183 = arith.constant 3.200000e+01 : f32
    %484 = vector.broadcast %cst_183 : f32 to vector<8x1xf32>
    %485 = arith.divf %483, %484 : vector<8x1xf32>
    %486 = vector.broadcast %485 : vector<8x1xf32> to vector<8x32xf32>
    %487 = arith.subf %479, %486 : vector<8x32xf32>
    %488 = arith.mulf %487, %487 : vector<8x32xf32>
    %cst_184 = arith.constant dense<0.000000e+00> : vector<8xf32>
    %489 = vector.multi_reduction <add>, %488, %cst_184 [1] : vector<8x32xf32> to vector<8xf32>
    %490 = vector.shape_cast %489 : vector<8xf32> to vector<8x1xf32>
    %cst_185 = arith.constant 3.200000e+01 : f32
    %491 = vector.broadcast %cst_185 : f32 to vector<8x1xf32>
    %492 = arith.divf %490, %491 : vector<8x1xf32>
    %493 = vector.broadcast %485 : vector<8x1xf32> to vector<8x32xf32>
    %494 = arith.subf %479, %493 : vector<8x32xf32>
    %cst_186 = arith.constant 1.000000e-07 : f32
    %495 = vector.broadcast %cst_186 : f32 to vector<8x1xf32>
    %496 = arith.addf %492, %495 : vector<8x1xf32>
    %497 = math.rsqrt %496 : vector<8x1xf32>
    %498 = vector.broadcast %497 : vector<8x1xf32> to vector<8x32xf32>
    %499 = arith.mulf %494, %498 : vector<8x32xf32>
    %500 = vector.broadcast %480 : vector<1x32xf32> to vector<8x32xf32>
    %501 = arith.mulf %499, %500 : vector<8x32xf32>
    %502 = vector.broadcast %481 : vector<1x32xf32> to vector<8x32xf32>
    %503 = arith.addf %501, %502 : vector<8x32xf32>
    %504 = arith.truncf %503 : vector<8x32xf32> to vector<8x32xbf16>
    %c0_187 = arith.constant 0 : index
    %c0_188 = arith.constant 0 : index
    %505 = vector.load %arg23[%c0_187, %c0_188] : memref<32x128xbf16, #tpu.memory_space<vmem>>, vector<32x128xbf16>
    %cst_189 = arith.constant dense<0.000000e+00> : vector<8x128xf32>
    %506 = tpu.matmul %504, %505, %cst_189 {dimension_numbers = #tpu.dot_dimension_numbers<[1], [0], [0], [1], [0, 0, 1, 1], [], []>} : vector<8x32xbf16>, vector<32x128xbf16>, vector<8x128xf32> -> vector<8x128xf32>
    %c0_190 = arith.constant 0 : index
    %c0_191 = arith.constant 0 : index
    %507 = vector.load %arg24[%c0_190, %c0_191] : memref<1x128xf32, #tpu.memory_space<vmem>>, vector<1x128xf32>
    %508 = vector.broadcast %507 : vector<1x128xf32> to vector<8x128xf32>
    %509 = arith.addf %506, %508 : vector<8x128xf32>
    %510 = tpu.iota {dimensions = array<i32: 1>} : vector<8x128xi32>
    %c64_i32 = arith.constant 64 : i32
    %511 = vector.broadcast %c64_i32 : i32 to vector<8x128xi32>
    %512 = arith.cmpi slt, %510, %511 : vector<8x128xi32>
    %cst_192 = arith.constant -1.000000e+30 : f32
    %513 = vector.broadcast %cst_192 : f32 to vector<8x128xf32>
    %514 = arith.select %512, %509, %513 : vector<8x128xi1>, vector<8x128xf32>
    %cst_193 = arith.constant dense<0xFF800000> : vector<8xf32>
    %515 = vector.multi_reduction <maximumf>, %514, %cst_193 [1] : vector<8x128xf32> to vector<8xf32>
    %516 = vector.shape_cast %515 : vector<8xf32> to vector<8x1xf32>
    %517 = vector.broadcast %516 : vector<8x1xf32> to vector<8x128xf32>
    %518 = arith.subf %514, %517 : vector<8x128xf32>
    %519 = math.exp %518 : vector<8x128xf32>
    %cst_194 = arith.constant dense<0.000000e+00> : vector<8xf32>
    %520 = vector.multi_reduction <add>, %519, %cst_194 [1] : vector<8x128xf32> to vector<8xf32>
    %521 = vector.shape_cast %520 : vector<8xf32> to vector<8x1xf32>
    %522 = math.log %521 : vector<8x1xf32>
    %523 = arith.addf %522, %516 : vector<8x1xf32>
    %c0_195 = arith.constant 0 : index
    %c0_196 = arith.constant 0 : index
    %c0_197 = arith.constant 0 : index
    %524 = vector.load %arg4[%c0_195, %c0_196, %c0_197] : memref<1x8x1xi32, #tpu.memory_space<vmem>>, vector<1x8x1xi32>
    %525 = vector.shape_cast %524 : vector<1x8x1xi32> to vector<8x1xi32>
    %c0_i32_198 = arith.constant 0 : i32
    %526 = vector.broadcast %c0_i32_198 : i32 to vector<8x1xi32>
    %527 = arith.cmpi sge, %525, %526 : vector<8x1xi32>
    %528 = arith.extui %527 : vector<8x1xi1> to vector<8x1xi32>
    %529 = arith.sitofp %528 : vector<8x1xi32> to vector<8x1xf32>
    %530 = vector.broadcast %525 : vector<8x1xi32> to vector<8x128xi32>
    %531 = arith.cmpi eq, %510, %530 : vector<8x128xi32>
    %cst_199 = arith.constant 0.000000e+00 : f32
    %532 = vector.broadcast %cst_199 : f32 to vector<8x128xf32>
    %533 = arith.select %531, %509, %532 : vector<8x128xi1>, vector<8x128xf32>
    %cst_200 = arith.constant dense<0.000000e+00> : vector<8xf32>
    %534 = vector.multi_reduction <add>, %533, %cst_200 [1] : vector<8x128xf32> to vector<8xf32>
    %535 = vector.shape_cast %534 : vector<8xf32> to vector<8x1xf32>
    %536 = arith.subf %523, %535 : vector<8x1xf32>
    %537 = arith.mulf %536, %529 : vector<8x1xf32>
    %538 = vector.shape_cast %537 : vector<8x1xf32> to vector<1x8x1xf32>
    %cst_201 = arith.constant dense<0.000000e+00> : vector<1xf32>
    %539 = vector.multi_reduction <add>, %538, %cst_201 [1, 2] : vector<1x8x1xf32> to vector<1xf32>
    %540 = vector.shape_cast %539 : vector<1xf32> to vector<1x1x1xf32>
    %541 = vector.extract %540[0, 0, 0] : f32 from vector<1x1x1xf32>
    %542 = vector.broadcast %541 : f32 to vector<1x1xf32>
    %543 = vector.shape_cast %529 : vector<8x1xf32> to vector<1x8x1xf32>
    %cst_202 = arith.constant dense<0.000000e+00> : vector<1xf32>
    %544 = vector.multi_reduction <add>, %543, %cst_202 [1, 2] : vector<1x8x1xf32> to vector<1xf32>
    %545 = vector.shape_cast %544 : vector<1xf32> to vector<1x1x1xf32>
    %546 = vector.extract %545[0, 0, 0] : f32 from vector<1x1x1xf32>
    %547 = vector.broadcast %546 : f32 to vector<1x1xf32>
    %548 = vector.shape_cast %7 : vector<8x1xf32> to vector<1x8x1xf32>
    %cst_203 = arith.constant dense<0.000000e+00> : vector<1xf32>
    %549 = vector.multi_reduction <add>, %548, %cst_203 [1, 2] : vector<1x8x1xf32> to vector<1xf32>
    %550 = vector.shape_cast %549 : vector<1xf32> to vector<1x1x1xf32>
    %551 = vector.extract %550[0, 0, 0] : f32 from vector<1x1x1xf32>
    %552 = vector.broadcast %551 : f32 to vector<1x1xf32>
    %cst_204 = arith.constant 0.000000e+00 : f32
    %553 = vector.broadcast %cst_204 : f32 to vector<1x1xf32>
    %cst_205 = arith.constant 5.000000e-01 : f32
    %554 = vector.broadcast %cst_205 : f32 to vector<8x16xf32>
    %555 = arith.mulf %554, %68 : vector<8x16xf32>
    %cst_206 = arith.constant 5.000000e-01 : f32
    %556 = vector.broadcast %cst_206 : f32 to vector<8x16xf32>
    %557 = arith.mulf %556, %460 : vector<8x16xf32>
    %558 = arith.addf %555, %557 : vector<8x16xf32>
    %559 = arith.subf %264, %558 : vector<8x16xf32>
    %560 = arith.mulf %559, %559 : vector<8x16xf32>
    %cst_207 = arith.constant dense<0.000000e+00> : vector<8xf32>
    %561 = vector.multi_reduction <add>, %560, %cst_207 [1] : vector<8x16xf32> to vector<8xf32>
    %562 = vector.shape_cast %561 : vector<8xf32> to vector<8x1xf32>
    %cst_208 = arith.constant 5.000000e-01 : f32
    %563 = vector.broadcast %cst_208 : f32 to vector<8x1xf32>
    %564 = arith.divf %562, %563 : vector<8x1xf32>
    %cst_209 = arith.constant 18.3156776 : f32
    %565 = vector.broadcast %cst_209 : f32 to vector<8x1xf32>
    %566 = arith.addf %564, %565 : vector<8x1xf32>
    %cst_210 = arith.constant 5.000000e-01 : f32
    %567 = vector.broadcast %cst_210 : f32 to vector<8x1xf32>
    %568 = arith.mulf %567, %566 : vector<8x1xf32>
    %569 = arith.mulf %568, %7 : vector<8x1xf32>
    %570 = vector.shape_cast %569 : vector<8x1xf32> to vector<1x8x1xf32>
    %cst_211 = arith.constant dense<0.000000e+00> : vector<1xf32>
    %571 = vector.multi_reduction <add>, %570, %cst_211 [1, 2] : vector<1x8x1xf32> to vector<1xf32>
    %572 = vector.shape_cast %571 : vector<1xf32> to vector<1x1x1xf32>
    %573 = vector.extract %572[0, 0, 0] : f32 from vector<1x1x1xf32>
    %574 = vector.broadcast %573 : f32 to vector<1x1xf32>
    %575 = arith.addf %553, %574 : vector<1x1xf32>
    %576 = tpu.iota {dimensions = array<i32: 1>} : vector<1x128xi32>
    %c0_i32_212 = arith.constant 0 : i32
    %577 = vector.broadcast %c0_i32_212 : i32 to vector<1x128xi32>
    %578 = arith.cmpi eq, %576, %577 : vector<1x128xi32>
    %cst_213 = arith.constant 0.000000e+00 : f32
    %579 = vector.shape_cast %542 : vector<1x1xf32> to vector<1x1xf32>
    %580 = vector.broadcast %579 : vector<1x1xf32> to vector<1x128xf32>
    %581 = vector.broadcast %cst_213 : f32 to vector<1x128xf32>
    %582 = arith.select %578, %580, %581 : vector<1x128xi1>, vector<1x128xf32>
    %c1_i32 = arith.constant 1 : i32
    %583 = vector.broadcast %c1_i32 : i32 to vector<1x128xi32>
    %584 = arith.cmpi eq, %576, %583 : vector<1x128xi32>
    %cst_214 = arith.constant 0.000000e+00 : f32
    %585 = vector.shape_cast %547 : vector<1x1xf32> to vector<1x1xf32>
    %586 = vector.broadcast %585 : vector<1x1xf32> to vector<1x128xf32>
    %587 = vector.broadcast %cst_214 : f32 to vector<1x128xf32>
    %588 = arith.select %584, %586, %587 : vector<1x128xi1>, vector<1x128xf32>
    %589 = arith.addf %582, %588 : vector<1x128xf32>
    %c2_i32 = arith.constant 2 : i32
    %590 = vector.broadcast %c2_i32 : i32 to vector<1x128xi32>
    %591 = arith.cmpi eq, %576, %590 : vector<1x128xi32>
    %cst_215 = arith.constant 0.000000e+00 : f32
    %592 = vector.shape_cast %575 : vector<1x1xf32> to vector<1x1xf32>
    %593 = vector.broadcast %592 : vector<1x1xf32> to vector<1x128xf32>
    %594 = vector.broadcast %cst_215 : f32 to vector<1x128xf32>
    %595 = arith.select %591, %593, %594 : vector<1x128xi1>, vector<1x128xf32>
    %596 = arith.addf %589, %595 : vector<1x128xf32>
    %c3_i32 = arith.constant 3 : i32
    %597 = vector.broadcast %c3_i32 : i32 to vector<1x128xi32>
    %598 = arith.cmpi eq, %576, %597 : vector<1x128xi32>
    %cst_216 = arith.constant 0.000000e+00 : f32
    %599 = vector.shape_cast %552 : vector<1x1xf32> to vector<1x1xf32>
    %600 = vector.broadcast %599 : vector<1x1xf32> to vector<1x128xf32>
    %601 = vector.broadcast %cst_216 : f32 to vector<1x128xf32>
    %602 = arith.select %598, %600, %601 : vector<1x128xi1>, vector<1x128xf32>
    %603 = arith.addf %596, %602 : vector<1x128xf32>
    %c0_217 = arith.constant 0 : index
    %c0_218 = arith.constant 0 : index
    %c0_219 = arith.constant 0 : index
    %604 = vector.load %arg27[%c0_217, %c0_218, %c0_219] : memref<1x1x128xf32, #tpu.memory_space<vmem>>, vector<1x1x128xf32>
    %605 = vector.shape_cast %604 : vector<1x1x128xf32> to vector<1x128xf32>
    %606 = vector.shape_cast %603 : vector<1x128xf32> to vector<1x1x128xf32>
    tpu.vector_store %arg27[%c0_217, %c0_218, %c0_219], %606 {strides = array<i32>} : memref<1x1x128xf32, #tpu.memory_space<vmem>>, vector<1x1x128xf32>,
    return
  }
  func.func @transform_0(%arg0: i32) -> (i32, i32, i32) {
    %c0_i32 = arith.constant 0 : i32
    %c0_i32_0 = arith.constant 0 : i32
    %c0_i32_1 = arith.constant 0 : i32
    return %arg0, %c0_i32, %c0_i32_0 : i32, i32, i32
  }
  func.func @transform_1(%arg0: i32) -> (i32, i32, i32) {
    %c0_i32 = arith.constant 0 : i32
    %c0_i32_0 = arith.constant 0 : i32
    %c0_i32_1 = arith.constant 0 : i32
    return %arg0, %c0_i32, %c0_i32_0 : i32, i32, i32
  }
  func.func @transform_2(%arg0: i32) -> (i32, i32, i32) {
    %c0_i32 = arith.constant 0 : i32
    %c0_i32_0 = arith.constant 0 : i32
    %c0_i32_1 = arith.constant 0 : i32
    return %arg0, %c0_i32, %c0_i32_0 : i32, i32, i32
  }
  func.func @transform_3(%arg0: i32) -> (i32, i32, i32) {
    %c0_i32 = arith.constant 0 : i32
    %c0_i32_0 = arith.constant 0 : i32
    %c0_i32_1 = arith.constant 0 : i32
    return %arg0, %c0_i32, %c0_i32_0 : i32, i32, i32
  }
  func.func @transform_4(%arg0: i32) -> (i32, i32) {
    %c0_i32 = arith.constant 0 : i32
    %c0_i32_0 = arith.constant 0 : i32
    %c0_i32_1 = arith.constant 0 : i32
    return %c0_i32, %c0_i32_0 : i32, i32
  }
  func.func @transform_5(%arg0: i32) -> (i32, i32) {
    %c0_i32 = arith.constant 0 : i32
    %c0_i32_0 = arith.constant 0 : i32
    %c0_i32_1 = arith.constant 0 : i32
    return %c0_i32, %c0_i32_0 : i32, i32
  }
  func.func @transform_6(%arg0: i32) -> (i32, i32, i32) {
    %c0_i32 = arith.constant 0 : i32
    %c0_i32_0 = arith.constant 0 : i32
    %c0_i32_1 = arith.constant 0 : i32
    %c0_i32_2 = arith.constant 0 : i32
    return %c0_i32, %c0_i32_0, %c0_i32_1 : i32, i32, i32
  }
  func.func @transform_7(%arg0: i32) -> (i32, i32, i32) {
    %c0_i32 = arith.constant 0 : i32
    %c0_i32_0 = arith.constant 0 : i32
    %c0_i32_1 = arith.constant 0 : i32
    %c0_i32_2 = arith.constant 0 : i32
    return %c0_i32, %c0_i32_0, %c0_i32_1 : i32, i32, i32
  }
  func.func @transform_8(%arg0: i32) -> (i32, i32, i32) {
    %c0_i32 = arith.constant 0 : i32
    %c0_i32_0 = arith.constant 0 : i32
    %c0_i32_1 = arith.constant 0 : i32
    %c0_i32_2 = arith.constant 0 : i32
    return %c0_i32, %c0_i32_0, %c0_i32_1 : i32, i32, i32
  }
  func.func @transform_9(%arg0: i32) -> (i32, i32, i32) {
    %c0_i32 = arith.constant 0 : i32
    %c0_i32_0 = arith.constant 0 : i32
    %c0_i32_1 = arith.constant 0 : i32
    %c0_i32_2 = arith.constant 0 : i32
    return %c0_i32, %c0_i32_0, %c0_i32_1 : i32, i32, i32
  }
  func.func @transform_10(%arg0: i32) -> (i32, i32, i32) {
    %c0_i32 = arith.constant 0 : i32
    %c0_i32_0 = arith.constant 0 : i32
    %c0_i32_1 = arith.constant 0 : i32
    %c0_i32_2 = arith.constant 0 : i32
    return %c0_i32, %c0_i32_0, %c0_i32_1 : i32, i32, i32
  }
  func.func @transform_11(%arg0: i32) -> (i32, i32, i32) {
    %c0_i32 = arith.constant 0 : i32
    %c0_i32_0 = arith.constant 0 : i32
    %c0_i32_1 = arith.constant 0 : i32
    %c0_i32_2 = arith.constant 0 : i32
    return %c0_i32, %c0_i32_0, %c0_i32_1 : i32, i32, i32
  }
  func.func @transform_12(%arg0: i32) -> (i32, i32, i32) {
    %c0_i32 = arith.constant 0 : i32
    %c0_i32_0 = arith.constant 0 : i32
    %c0_i32_1 = arith.constant 0 : i32
    %c0_i32_2 = arith.constant 0 : i32
    return %c0_i32, %c0_i32_0, %c0_i32_1 : i32, i32, i32
  }
  func.func @transform_13(%arg0: i32) -> (i32, i32, i32) {
    %c0_i32 = arith.constant 0 : i32
    %c0_i32_0 = arith.constant 0 : i32
    %c0_i32_1 = arith.constant 0 : i32
    %c0_i32_2 = arith.constant 0 : i32
    return %c0_i32, %c0_i32_0, %c0_i32_1 : i32, i32, i32
  }
  func.func @transform_14(%arg0: i32) -> (i32, i32, i32) {
    %c0_i32 = arith.constant 0 : i32
    %c0_i32_0 = arith.constant 0 : i32
    %c0_i32_1 = arith.constant 0 : i32
    %c0_i32_2 = arith.constant 0 : i32
    return %c0_i32, %c0_i32_0, %c0_i32_1 : i32, i32, i32
  }
  func.func @transform_15(%arg0: i32) -> (i32, i32, i32) {
    %c0_i32 = arith.constant 0 : i32
    %c0_i32_0 = arith.constant 0 : i32
    %c0_i32_1 = arith.constant 0 : i32
    %c0_i32_2 = arith.constant 0 : i32
    return %c0_i32, %c0_i32_0, %c0_i32_1 : i32, i32, i32
  }
  func.func @transform_16(%arg0: i32) -> (i32, i32, i32) {
    %c0_i32 = arith.constant 0 : i32
    %c0_i32_0 = arith.constant 0 : i32
    %c0_i32_1 = arith.constant 0 : i32
    %c0_i32_2 = arith.constant 0 : i32
    return %c0_i32, %c0_i32_0, %c0_i32_1 : i32, i32, i32
  }
  func.func @transform_17(%arg0: i32) -> (i32, i32, i32) {
    %c0_i32 = arith.constant 0 : i32
    %c0_i32_0 = arith.constant 0 : i32
    %c0_i32_1 = arith.constant 0 : i32
    %c0_i32_2 = arith.constant 0 : i32
    return %c0_i32, %c0_i32_0, %c0_i32_1 : i32, i32, i32
  }
  func.func @transform_18(%arg0: i32) -> (i32, i32) {
    %c0_i32 = arith.constant 0 : i32
    %c0_i32_0 = arith.constant 0 : i32
    %c0_i32_1 = arith.constant 0 : i32
    return %c0_i32, %c0_i32_0 : i32, i32
  }
  func.func @transform_19(%arg0: i32) -> (i32, i32) {
    %c0_i32 = arith.constant 0 : i32
    %c0_i32_0 = arith.constant 0 : i32
    %c0_i32_1 = arith.constant 0 : i32
    return %c0_i32, %c0_i32_0 : i32, i32
  }
  func.func @transform_20(%arg0: i32) -> (i32, i32) {
    %c0_i32 = arith.constant 0 : i32
    %c0_i32_0 = arith.constant 0 : i32
    %c0_i32_1 = arith.constant 0 : i32
    return %c0_i32, %c0_i32_0 : i32, i32
  }
  func.func @transform_21(%arg0: i32) -> (i32, i32) {
    %c0_i32 = arith.constant 0 : i32
    %c0_i32_0 = arith.constant 0 : i32
    %c0_i32_1 = arith.constant 0 : i32
    return %c0_i32, %c0_i32_0 : i32, i32
  }
  func.func @transform_22(%arg0: i32) -> (i32, i32) {
    %c0_i32 = arith.constant 0 : i32
    %c0_i32_0 = arith.constant 0 : i32
    %c0_i32_1 = arith.constant 0 : i32
    return %c0_i32, %c0_i32_0 : i32, i32
  }
  func.func @transform_23(%arg0: i32) -> (i32, i32) {
    %c0_i32 = arith.constant 0 : i32
    %c0_i32_0 = arith.constant 0 : i32
    %c0_i32_1 = arith.constant 0 : i32
    return %c0_i32, %c0_i32_0 : i32, i32
  }
  func.func @transform_24(%arg0: i32) -> (i32, i32) {
    %c0_i32 = arith.constant 0 : i32
    %c0_i32_0 = arith.constant 0 : i32
    %c0_i32_1 = arith.constant 0 : i32
    return %c0_i32, %c0_i32_0 : i32, i32
  }
  func.func @transform_25(%arg0: i32) -> (i32, i32) {
    %c0_i32 = arith.constant 0 : i32
    %c0_i32_0 = arith.constant 0 : i32
    %c0_i32_1 = arith.constant 0 : i32
    return %c0_i32, %c0_i32_0 : i32, i32
  }
  func.func @transform_26(%arg0: i32) -> (i32, i32, i32) {
    %c0_i32 = arith.constant 0 : i32
    %c0_i32_0 = arith.constant 0 : i32
    %c0_i32_1 = arith.constant 0 : i32
    return %arg0, %c0_i32, %c0_i32_0 : i32, i32, i32
  }
}

</mosaic_0001>

<bundles_post_ra>
// kernel: bridge_deberta_forward.1
= control target key start
LH: loop header
LB: loop body
LE: loop exit
PB: predicated region body
PF: predicated region fallthrough
CT: control target
= control target key end

     0   :  { %s2681_s27 = smov 0   ;;  %s3082_s0 = inlined_call_operand.vmem [shape: f32[2,8,32], index: 0, kind: input, shape index: {}]   ;;  %s3083_s1 = inlined_call_operand.vmem [shape: f32[2,1,8], index: 1, kind: input, shape index: {}]   ;;  %s3084_s2 = inlined_call_operand.vmem [shape: f32[2,8,1], index: 2, kind: input, shape index: {}]   ;;  %s3085_s3 = inlined_call_operand.vmem [shape: s32[2,8,1], index: 3, kind: input, shape index: {}]   ;;  %s3086_s4 = inlined_call_operand.vmem [shape: f32[1,32], index: 4, kind: input, shape index: {}]   ;;  %s3087_s5 = inlined_call_operand.vmem [shape: f32[1,32], index: 5, kind: input, shape index: {}]   ;;  %s3088_s6 = inlined_call_operand.vmem [shape: bf16[2,32,96], index: 6, kind: input, shape index: {}]   ;;  %s3089_s7 = inlined_call_operand.vmem [shape: f32[2,1,96], index: 7, kind: input, shape index: {}]   ;;  %s3090_s8 = inlined_call_operand.vmem [shape: bf16[2,32,32], index: 8, kind: input, shape index: {}]   ;;  %s3091_s9 = inlined_call_operand.vmem [shape: f32[2,1,32], index: 9, kind: input, shape index: {}]   ;;  %s3092_s10 = inlined_call_operand.vmem [shape: f32[2,1,32], index: 10, kind: input, shape index: {}]   ;;  %s3093_s11 = inlined_call_operand.vmem [shape: f32[2,1,32], index: 11, kind: input, shape index: {}]   ;;  %s3094_s12 = inlined_call_operand.vmem [shape: bf16[2,32,64], index: 12, kind: input, shape index: {}]   ;;  %s3095_s13 = inlined_call_operand.vmem [shape: f32[2,1,64], index: 13, kind: input, shape index: {}]   ;;  %s3096_s14 = inlined_call_operand.vmem [shape: bf16[2,64,32], index: 14, kind: input, shape index: {}]   ;;  %s3097_s15 = inlined_call_operand.vmem [shape: f32[2,1,32], index: 15, kind: input, shape index: {}]   ;;  %s3098_s16 = inlined_call_operand.vmem [shape: f32[2,1,32], index: 16, kind: input, shape index: {}]   ;;  %s3099_s17 = inlined_call_operand.vmem [shape: f32[2,1,32], index: 17, kind: input, shape index: {}]   ;;  %s3100_s18 = inlined_call_operand.vmem [shape: bf16[32,32], index: 18, kind: input, shape index: {}]   ;;  %s3101_s19 = inlined_call_operand.vmem [shape: f32[1,32], index: 19, kind: input, shape index: {}]   ;;  %s3102_s20 = inlined_call_operand.vmem [shape: f32[1,32], index: 20, kind: input, shape index: {}]   ;;  %s3103_s21 = inlined_call_operand.vmem [shape: f32[1,32], index: 21, kind: input, shape index: {}]   ;;  %s3104_s22 = inlined_call_operand.vmem [shape: bf16[32,128], index: 22, kind: input, shape index: {}]   ;;  %s3105_s23 = inlined_call_operand.vmem [shape: f32[1,128], index: 23, kind: input, shape index: {}]   ;;  %s3106_s24 = inlined_call_operand.vmem [shape: bf16[32,16], index: 24, kind: input, shape index: {}]   ;;  %s3107_s25 = inlined_call_operand.vmem [shape: f32[1,16], index: 25, kind: input, shape index: {}]   ;;  %s3108_s26 = inlined_call_operand.vmem [shape: f32[2,1,128], index: 26, kind: output, shape index: {}]  }
   0x1   :  { %3118 = sst [smem:[#allocation3_spill]] %s3082_s0 }
   0x2   :  { %3119 = sst [smem:[#allocation4_spill]] %s3083_s1 }
   0x3   :  { %3120 = sst [smem:[#allocation5_spill]] %s3084_s2 }
   0x4   :  { %3121 = sst [smem:[#allocation6_spill]] %s3085_s3 }
   0x5   :  { %3122 = sst [smem:[#allocation7_spill]] %s3086_s4 }
   0x6   :  { %3123 = sst [smem:[#allocation8_spill]] %s3087_s5 }
   0x7   :  { %3124 = sst [smem:[#allocation9_spill]] %s3088_s6 }
   0x8   :  { %3125 = sst [smem:[#allocation10_spill]] %s3089_s7 }
   0x9   :  { %3126 = sst [smem:[#allocation11_spill]] %s3090_s8 }
   0xa   :  { %3127 = sst [smem:[#allocation12_spill]] %s3091_s9 }
   0xb   :  { %3128 = sst [smem:[#allocation13_spill]] %s3092_s10 }
   0xc   :  { %3129 = sst [smem:[#allocation14_spill]] %s3106_s24 }
   0xd   :  { %3130 = sst [smem:[#allocation15_spill]] %s3108_s26 }
   0xe LB: > { %3131 = sst [smem:[#allocation2_spill]] %s2538_s27  ;;  %s2220_s3 = sadd.s32 4294967295, %s2538_s27   ;;  %s2538_s27 = sphi %s2681_s27, %s36_s27  }
   0xf   : > { %p2224_p0 = scmp.ge.s32.totalorder %s2538_s27, 1  ;;  %p737_p1 = scmp.lt.s32.totalorder %s2538_s27, 3 }
  0x11   : > { %p738_p2 = pnand %p2224_p0, %p737_p1 }
  0x12   : > { %p815_p3 = scmp.lt.s32.totalorder (!%p738_p2), %s2220_s3, 1  ;;  %s3132_s4 = sld [smem:[#allocation3_spill]] (!%p738_p2) }
  0x13   : > { %741 = sbr.rel (%p738_p2) target bundleno = 5584 (0x15d0), region = 124  ;;  %s3133_s24 = sld [smem:[#allocation14_spill]] (!%p738_p2) }
  0x14   : > { %s3134_s5 = sld [smem:[#allocation9_spill]] (!%p738_p2)  ;;  %s3114_s8 = smov (!%p738_p2), 64  }
  0x15   : > { %s3135_s0 = sld [smem:[#allocation7_spill]] (!%p738_p2)  ;;  %s3116_s28 = smov (!%p738_p2), 96  }
  0x16   : > { %s3136_s2 = sld [smem:[#allocation8_spill]] (!%p738_p2)  ;;  %s3142_s27 = smov (!%p738_p2), 96  }
  0x17   : > { %s3137_s1 = sld [smem:[#allocation10_spill]] (!%p738_p2) }
  0x18   : > { %s3149_s3 = smov (!%p815_p3, %s2220_s3), 1  ;;  %vm863_vm0 = vcmask 261120   ;;  %v2540_v2 = vmov 32.0   ;;  %v838_v18 = vlaneseq  ;;  %v2541_v23 = vmov 0.0   ;;  %s3139_s10 = sld [smem:[#allocation11_spill]] }
  0x19   : > { %s2692_s7 = sshll.u32 %s3149_s3, 3  ;;  %2474 = vrcp.f32 %v2540_v2  ;;  %v2706_v14 = vld [vmem:[%s3133_s24 + $0x8] sm:$0xff]  ;;  %v2715_v16 = vld [vmem:[%s3133_s24] sm:$0xff]  ;;  %vm1060_vm9 = vcmask 1043456   ;;  %vm999_vm13 = vcmask 64512   ;;  %s3141_s30 = sld [smem:[#allocation13_spill]] }
  0x1a   : > { %s818_s29 = scalar_lea.vmem %s3132_s4, %s2692_s7  ;;  %v2400_v15 = vld [vmem:[%s3134_s5 + $0x8] sm:$0xff]  ;;  %931 = vmatpush.bf16.msra.mxu0 %v2706_v14  ;;  %v2399_v17 = vld [vmem:[%s3134_s5] sm:$0xff]  ;;  %v2722_v21 = vand.u32 127, %v838_v18  ;;  %s3146_s4 = sld [smem:[#allocation15_spill]] }
  0x1b   : > { %v860_v0 = vld [vmem:[%s818_s29] sm:$0xff]  ;;  %964 = vmatpush.bf16.msra.mxu1 %v2400_v15 }
  0x1c   : > { %v864_v1 = vsel %vm863_vm0, %v860_v0, 0.0  ;;  %vm845_vm2 = vcmp.ge.s32.totalorder %v2722_v21, 8  ;;  %vm846_vm3 = vcmp.lt.s32.totalorder %v2722_v21, 16  ;;  %v2451_v31 = vld [vmem:[%s3135_s0] ss:$0 sm:$0xff]  ;;  %vm841_vm8 = vcmp.lt.s32.totalorder %v2722_v21, 8 }
  0x1d   : > { %865 = vadd.xlane.f32.xlu0 %v864_v1  ;;  %vm847_vm4 = vmand %vm845_vm2, %vm846_vm3  ;;  %v2452_v34 = vld [vmem:[%s3136_s2] ss:$0 sm:$0xff]  ;;  %v2760_v49 = vsel %vm841_vm8, 1.0, %v2541_v23  ;;  %vm850_vm10 = vcmp.ge.s32.totalorder %v2722_v21, 16  ;;  %vm851_vm11 = vcmp.lt.s32.totalorder %v2722_v21, 24  ;;  %s3138_s0 = sld [smem:[#allocation4_spill]] }
  0x1e   : > { %932 = vmatpush.bf16.msra.mxu0 %v2715_v16  ;;  %v2727_v24 = vsel %vm847_vm4, 1.0, %v2541_v23  ;;  %v2454_v38 = vld [vmem:[%s3137_s1] ss:$0 sm:$0xff]  ;;  %vm852_vm12 = vmand %vm850_vm10, %vm851_vm11  ;;  %vm855_vm14 = vcmp.ge.s32.totalorder %v2722_v21, 24  ;;  %vm856_vm15 = vcmp.lt.s32.totalorder %v2722_v21, 32  ;;  %s3144_s2 = sld [smem:[#allocation6_spill]] }
  0x1f   : > { %v2475_v3 = vpop.eup %2474  ;;  %965 = vmatpush.bf16.msra.mxu1 %v2399_v17  ;;  %1049 = vrot.lane.b32.xlu2 %v2727_v24, %s3114_s8  ;;  %v2773_v57 = vsel %vm852_vm12, 1.0, %v2541_v23 }
  0x20   : > { %v868_v4 = vmul.f32 32.0, %v2475_v3  ;;  %vm872_vm1 = vweird.f32 %v2475_v3  ;;  %s832_s29 = scalar_lea.vmem %s3146_s4, %s3149_s3 }
  0x22   : > { %v869_v5 = vsub.f32 1.0, %v868_v4 }
  0x23   : > { %s821_s9 = scalar_lea.vmem %s3138_s0, %s3149_s3 }
  0x24   : > { %v870_v6 = vmul.f32 %v2475_v3, %v869_v5  ;;  %v834_v60 = vld [vmem:[%s821_s9] sm:$0x1]  ;;  %s3140_s9 = sld [smem:[#allocation12_spill]]  ;;  %s829_s6 = scalar_lea.vmem %s3144_s2, %s2692_s7 }
  0x25   : > { %v2228_v61 = vadd.f32 -1.0, %v834_v60  ;;  %s3145_s2 = sld [smem:[#allocation5_spill]] }
  0x26   : > { %v871_v7 = vadd.f32 %v2475_v3, %v870_v6 }
  0x27   : > { %v836_v62 = vmul.f32 1e+09, %v2228_v61 }
  0x28   : > { %v2699_v8 = vsel %vm872_vm1, %v2475_v3, %v871_v7  ;;  %vm857_vm1 = vmand %vm855_vm14, %vm856_vm15  ;;  %vm2098_vm15 = vcmask 130048  }
  0x29   : > { %v2782_v63 = vperm.slane %v836_v62, 0 }
  0x79   : > { %v2746_v39 = vpop.permute.xlu2 %1049 }
  0x90   : > { %v866_v9 = vpop.xlane.xlu0 %865 }
  0x91   : > { %v874_v10 = vmul.f32 %v2699_v8, %v866_v9 }
  0x93   : > { %v875_v11 = vsub.f32 %v860_v0, %v874_v10 }
  0x95   : > { %v876_v12 = vmul.f32 %v875_v11, %v875_v11 }
  0x97   : > { %v877_v13 = vsel %vm863_vm0, %v876_v12, 0.0 }
  0x98   : > { %878 = vadd.xlane.f32.xlu0 %v877_v13 }
 0x10b   : > { %v879_v19 = vpop.xlane.xlu0 %878 }
 0x10c   : > { %v880_v20 = vmul.f32 %v879_v19, %v2699_v8 }
 0x10e   : > { %v881_v22 = vadd.f32 1e-07, %v880_v20 }
 0x110   : > { %2476 = vrsqrt.f32 %v881_v22  ;;  %vm888_vm6 = vweird.f32 %v881_v22 }
 0x116   : > { %v2477_v25 = vpop.eup %2476 }
 0x117   : > { %v883_v26 = vmul.f32 %v2477_v25, %v881_v22  ;;  %vm889_vm5 = vweird.f32 %v2477_v25 }
 0x118   : > { %vm890_vm7 = vmor %vm888_vm6, %vm889_vm5  ;;  %vm1370_vm5 = vcmask 523264  }
 0x119   : > { %v884_v27 = vmul.f32 %v2477_v25, %v883_v26 }
 0x11b   : > { %v885_v28 = vmul.f32 0.5, %v884_v27 }
 0x11d   : > { %v886_v29 = vsub.f32 1.5, %v885_v28  ;;  %v2445_v28 = vpack.i.bf16 %v2773_v57, %v2760_v49 }
 0x11f   : > { %v887_v30 = vmul.f32 %v2477_v25, %v886_v29 }
 0x121   : > { %v891_v32 = vsel %vm890_vm7, %v2477_v25, %v887_v30 }
 0x122   : > { %v892_v33 = vmul.f32 %v891_v32, %v875_v11 }
 0x124   : > { %v896_v35 = vmul.f32 %v2451_v31, %v892_v33 }
 0x126   : > { %v2737_v36 = vadd.f32 %v2452_v34, %v896_v35 }
 0x128   : > { %v906_v37 = vpack.c.bf16 %v2737_v36, %v2737_v36 }
 0x12a   : > { %2241 = vmatmul.msk.bf16.vlgmr.msra.gmra.mxu0 %vm863_vm0, %v906_v37  ;;  %2250 = vmatmul.msk.bf16.vlgmr.msra.gmra.mxu1 %vm863_vm0, %v906_v37 }
 0x1a7   : > { %v2748_v40 = vpop.f32.mrf.mxu0  ;;  %v967_v41 = vpop.f32.mrf.mxu1 }
 0x1a8   : > { %v2750_v42 = vadd.f32 %v2454_v38, %v967_v41  ;;  %v2803_v38 = vsel %vm857_vm1, 1.0, %v2541_v23 }
 0x1aa   : > { %v1052_v43 = vmul.f32 %v2746_v39, %v2750_v42  ;;  %v971_v44 = vpack.c.bf16 %v2750_v42, %v2750_v42  ;;  %v972_v53 = vmul.f32 %v2760_v49, %v2750_v42  ;;  %v1018_v54 = vmul.f32 %v2727_v24, %v2750_v42 }
 0x1ab   : > { %v1099_v58 = vmul.f32 %v2773_v57, %v2750_v42 }
 0x1ac   : > { %v1053_v45 = vpack.c.bf16 %v1052_v43, %v1052_v43  ;;  %978 = vrot.lane.b32.xlu1 %v971_v44, %s3116_s28  ;;  %v973_v55 = vpack.c.bf16 %v972_v53, %v972_v53  ;;  %v1019_v56 = vpack.c.bf16 %v1018_v54, %v1018_v54 }
 0x1ad   : > { %v1100_v59 = vpack.c.bf16 %v1099_v58, %v1099_v58 }
 0x1ae   : > { %1055 = vrot.lane.b32.xlu0 %v1053_v45, %s3114_s8 }
 0x1af   : > { %v936_v46 = vpop.f32.mrf.mxu0  ;;  %v969_v47 = vpop.f32.mrf.mxu1 }
 0x1b0   : > { %v1158_v46 = vmul.f32 %v2803_v38, %v2750_v42 }
 0x1b2   : > { %v1159_v47 = vpack.c.bf16 %v1158_v46, %v1158_v46 }
 0x21e   : > { %v979_v48 = vpop.permute.xlu1 %978 }
 0x21f   : > { %v984_v50 = vsel %vm863_vm0, %v979_v48, 0 }
 0x220   : > { %v1056_v51 = vpop.permute.xlu0 %1055  ;;  %993 = vmatpush.bf16.xpose.msra.mxu2 %v984_v50  ;;  %1030 = vmatpush.bf16.xpose.msra.mxu3 %v984_v50 }
 0x221   : > { %v1062_v52 = vsel %vm1060_vm9, %v1056_v51, 0 }
 0x222   : > { %1071 = vmatpush.bf16.msrb.mxu0 %v1062_v52 }
 0x226   : > { %1170 = vmatpush.bf16.xpose.msra.mxu0 %v984_v50 }
 0x227   : > { %2251 = vmatmul.msk.bf16.vlgmr.msra.gmra.mxu2 %vm863_vm0, %v973_v55  ;;  %2252 = vmatmul.msk.bf16.vlgmr.msra.gmra.mxu3 %vm863_vm0, %v1019_v56 }
 0x228   : > { %1111 = vmatpush.bf16.xpose.msrb.mxu2 %v984_v50 }
 0x237   : > { %2255 = vmatmul.msk.bf16.vlgmr.msrb.gmra.mxu2 %vm863_vm0, %v1100_v59 }
 0x2aa   : > { %v995_v0 = vpop.f32.mrf.mxu2  ;;  %v1032_v1 = vpop.f32.mrf.mxu3 }
 0x2ab   : > { %v996_v2 = vadd.f32 %v995_v0, %v2782_v63  ;;  %v1033_v3 = vadd.f32 %v1032_v1, %v2782_v63 }
 0x2ad   : > { %v1036_v4 = vsel %vm999_vm13, %v1033_v3, -inf  ;;  %v1000_v5 = vsel %vm999_vm13, %v996_v2, -inf }
 0x2ae   : > { %1037 = vmax.xlane.f32.xlu1 %v1036_v4  ;;  %1001 = vmax.xlane.f32.xlu0 %v1000_v5 }
 0x2b2   : > { %v997_v6 = vpop.f32.mrf.mxu2  ;;  %v1034_v7 = vpop.f32.mrf.mxu3 }
 0x2ba   : > { %v1113_v9 = vpop.f32.mrf.mxu2 }
 0x2bb   : > { %v1114_v26 = vadd.f32 %v1113_v9, %v2782_v63 }
 0x2bd   : > { %v1117_v27 = vsel %vm999_vm13, %v1114_v26, -inf }
 0x2c2   : > { %v1115_v10 = vpop.f32.mrf.mxu2 }
 0x321   : > { %v1038_v11 = vpop.xlane.xlu1 %1037  ;;  %v1002_v12 = vpop.xlane.xlu0 %1001 }
 0x322   : > { %v1039_v13 = vsub.f32 %v1033_v3, %v1038_v11  ;;  %v1003_v15 = vsub.f32 %v996_v2, %v1002_v12 }
 0x324   : > { %v1040_v17 = vmul.f32 1.442695, %v1039_v13  ;;  %v1004_v18 = vmul.f32 1.442695, %v1003_v15 }
 0x326   : > { %2478 = vpow2.f32 %v1040_v17 }
 0x327   : > { %2480 = vpow2.f32 %v1004_v18 }
 0x32c   : > { %v2479_v19 = vpop.eup %2478 }
 0x32d   : > { %v2481_v20 = vpop.eup %2480  ;;  %v1042_v22 = vsel %vm999_vm13, %v2479_v19, 0.0 }
 0x32e   : > { %1043 = vadd.xlane.f32.xlu2 %v1042_v22  ;;  %v1006_v25 = vsel %vm999_vm13, %v2481_v20, 0.0 }
 0x32f   : > { %1007 = vadd.xlane.f32.xlu0 %v1006_v25 }
 0x336   : > { %1118 = vmax.xlane.f32.xlu2 %v1117_v27 }
 0x34e   : > { %2446 = vrot.lane.b32.xlu2 %v2445_v28, %s3114_s8 }
 0x3a1   : > { %v1044_v29 = vpop.xlane.xlu2 %1043 }
 0x3a2   : > { %2482 = vrcp.f32 %v1044_v29  ;;  %v1008_v48 = vpop.xlane.xlu0 %1007 }
 0x3a3   : > { %2484 = vrcp.f32 %v1008_v48  ;;  %v2455_v48 = vld [vmem:[%s3140_s9] ss:$0 sm:$0xff] }
 0x3a8   : > { %v2483_v30 = vpop.eup %2482 }
 0x3a9   : > { %v1046_v31 = vmul.f32 %v2483_v30, %v2479_v19  ;;  %v1119_v32 = vpop.xlane.xlu2 %1118  ;;  %v2485_v50 = vpop.eup %2484 }
 0x3aa   : > { %v1010_v51 = vmul.f32 %v2485_v50, %v2481_v20  ;;  %v1120_v1 = vsub.f32 %v1114_v26, %v1119_v32 }
 0x3ab   : > { %v1047_v33 = vpack.c.bf16 %v1046_v31, %v1046_v31 }
 0x3ac   : > { %v1011_v54 = vpack.c.bf16 %v1010_v51, %v1010_v51  ;;  %v1121_v2 = vmul.f32 1.442695, %v1120_v1 }
 0x3ad   : > { %2253 = vmatmul.msk.bf16.vlgmr.msrb.gmra.mxu0 %vm999_vm13, %v1047_v33  ;;  %v2401_v33 = vld [vmem:[%s3139_s10] sm:$0xff] }
 0x3ae   : > { %2486 = vpow2.f32 %v1121_v2 }
 0x3b1   : > { %v2798_v34 = vpop.permute.xlu2 %2446 }
 0x3b2   : > { %v2449_v35 = vunpack.i.h.bf16 %v2798_v34  ;;  %v2448_v37 = vunpack.i.l.bf16 %v2798_v34 }
 0x3b4   : > { %v1133_v41 = vmul.f32 %v2449_v35, %v2750_v42  ;;  %v1016_v43 = vmul.f32 %v2448_v37, %v2750_v42  ;;  %v2487_v3 = vpop.eup %2486 }
 0x3b5   : > { %v1123_v4 = vsel %vm999_vm13, %v2487_v3, 0.0 }
 0x3b6   : > { %v1017_v44 = vpack.c.bf16 %v1016_v43, %v1016_v43  ;;  %v1134_v45 = vpack.c.bf16 %v1133_v41, %v1133_v41 }
 0x3b8   : > { %1078 = vrot.lane.b32.xlu2 %v1017_v44, %s3114_s8  ;;  %1136 = vrot.lane.b32.xlu0 %v1134_v45, %s3114_s8 }
 0x3bd   : > { %2257 = vmatmul.msk.bf16.vlgmr.msra.gmra.mxu0 %vm863_vm0, %v1159_v47 }
 0x412   : > { %v1079_v52 = vpop.permute.xlu2 %1078 }
 0x413   : > { %v1084_v53 = vsel %vm1060_vm9, %v1079_v52, 0 }
 0x414   : > { %1093 = vmatpush.bf16.msrb.mxu1 %v1084_v53 }
 0x417   : > { %2254 = vmatmul.msk.bf16.vlgmr.msrb.gmra.mxu1 %vm999_vm13, %v1011_v54 }
 0x42a   : > { %v1137_v55 = vpop.permute.xlu0 %1136  ;;  %v1073_v56 = vpop.f32.mrf.mxu0 }
 0x42b   : > { %v1142_v58 = vsel %vm1060_vm9, %v1137_v55, 0 }
 0x42c   : > { %1151 = vmatpush.bf16.msrb.mxu3 %v1142_v58 }
 0x432   : > { %v1075_v59 = vpop.f32.mrf.mxu0 }
 0x43a   : > { %v1172_v60 = vpop.f32.mrf.mxu0 }
 0x43b   : > { %v1173_v61 = vadd.f32 %v1172_v60, %v2782_v63 }
 0x43d   : > { %v1176_v62 = vsel %vm999_vm13, %v1173_v61, -inf }
 0x43e   : > { %1177 = vmax.xlane.f32.xlu1 %v1176_v62 }
 0x442   : > { %v1174_v0 = vpop.f32.mrf.mxu0 }
 0x457   : > { %1189 = vrot.lane.b32.xlu1 %v2803_v38, %s3114_s8 }
 0x481   : > { %1124 = vadd.xlane.f32.xlu1 %v1123_v4 }
 0x494   : > { %v1095_v5 = vpop.f32.mrf.mxu1 }
 0x495   : > { %v1096_v41 = vadd.f32 %v1095_v5, %v1073_v56 }
 0x49c   : > { %v1097_v6 = vpop.f32.mrf.mxu1 }
 0x4b1   : > { %v1178_v7 = vpop.xlane.xlu1 %1177 }
 0x4b2   : > { %v1179_v9 = vsub.f32 %v1173_v61, %v1178_v7  ;;  %v2404_v61 = vld [vmem:[%s3094_s12 + $0x8] sm:$0xff] }
 0x4b3   : > { %1317 = vmatpush.bf16.msra.mxu3 %v2404_v61  ;;  %v2409_v61 = vld [vmem:[%s3134_s5 + $0x10] sm:$0xff] }
 0x4b4   : > { %v1180_v10 = vmul.f32 1.442695, %v1179_v9  ;;  %v2456_v9 = vld [vmem:[%s3141_s30] ss:$0 sm:$0xff] }
 0x4b6   : > { %2488 = vpow2.f32 %v1180_v10 }
 0x4bc   : > { %v2489_v11 = vpop.eup %2488 }
 0x4bd   : > { %v1182_v12 = vsel %vm999_vm13, %v2489_v11, 0.0 }
 0x4be   : > { %1183 = vadd.xlane.f32.xlu2 %v1182_v12 }
 0x4c9   : > { %v2825_v13 = vpop.permute.xlu1 %1189 }
 0x4ca   : > { %v1192_v15 = vmul.f32 %v2825_v13, %v2750_v42  ;;  %v2402_v42 = vld [vmem:[%s3139_s10 + $0x8] sm:$0xff] }
 0x4cb   : > { %1247 = vmatpush.bf16.msra.mxu2 %v2402_v42 }
 0x4cc   : > { %v1193_v17 = vpack.c.bf16 %v1192_v15, %v1192_v15 }
 0x4ce   : > { %1195 = vrot.lane.b32.xlu0 %v1193_v17, %s3114_s8  ;;  %s3143_s8 = smov 64  }
 0x4cf   : > { %1248 = vmatpush.bf16.msra.mxu2 %v2401_v33 }
 0x4f4   : > { %v1125_v18 = vpop.xlane.xlu1 %1124 }
 0x4f5   : > { %2490 = vrcp.f32 %v1125_v18 }
 0x4fb   : > { %v2491_v19 = vpop.eup %2490 }
 0x4fc   : > { %v1127_v20 = vmul.f32 %v2491_v19, %v2487_v3  ;;  %v2408_v19 = vld [vmem:[%s3096_s14 + $0x18] sm:$0xff] }
 0x4fd   : > { %1378 = vmatpush.bf16.msrb.mxu0 %v2408_v19  ;;  %v2462_v19 = vld [vmem:[%s3137_s1 + $0x1] ss:$0 sm:$0xff] }
 0x4fe   : > { %v1128_v22 = vpack.c.bf16 %v1127_v20, %v1127_v20  ;;  %v2407_v20 = vld [vmem:[%s3096_s14 + $0x10] sm:$0xff] }
 0x500   : > { %2256 = vmatmul.msk.bf16.vlgmr.msrb.gmra.mxu3 %vm999_vm13, %v1128_v22  ;;  %v2406_v22 = vld [vmem:[%s3096_s14 + $0x8] sm:$0xff] }
 0x501   : > { %1379 = vmatpush.bf16.msrb.mxu0 %v2407_v20 }
 0x505   : > { %1380 = vmatpush.bf16.msrb.mxu0 %v2406_v22 }
 0x531   : > { %v1184_v25 = vpop.xlane.xlu2 %1183 }
 0x532   : > { %2492 = vrcp.f32 %v1184_v25  ;;  %v2405_v25 = vld [vmem:[%s3096_s14] sm:$0xff] }
 0x533   : > { %1381 = vmatpush.bf16.msrb.mxu0 %v2405_v25 }
 0x538   : > { %v2493_v26 = vpop.eup %2492 }
 0x539   : > { %v1186_v27 = vmul.f32 %v2493_v26, %v2489_v11  ;;  %v2457_v11 = vld [vmem:[%s3093_s11] ss:$0 sm:$0xff] }
 0x53a   : > { %v2458_v26 = vld [vmem:[%s3095_s13] ss:$0 sm:$0xff] }
 0x53b   : > { %v1187_v30 = vpack.c.bf16 %v1186_v27, %v1186_v27 }
 0x540   : > { %v1196_v28 = vpop.permute.xlu0 %1195 }
 0x541   : > { %v1201_v29 = vsel %vm1060_vm9, %v1196_v28, 0 }
 0x542   : > { %1210 = vmatpush.bf16.msra.mxu1 %v1201_v29 }
 0x545   : > { %2258 = vmatmul.msk.bf16.vlgmr.msra.gmra.mxu1 %vm999_vm13, %v1187_v30 }
 0x546   : > { %1430 = vmatpush.bf16.msrb.mxu1 %v2706_v14 }
 0x54a   : > { %1431 = vmatpush.bf16.msrb.mxu1 %v2715_v16 }
 0x583   : > { %v1153_v31 = vpop.f32.mrf.mxu3 }
 0x584   : > { %v1157_v43 = vadd.f32 %v1153_v31, %v1096_v41 }
 0x58b   : > { %v1155_v32 = vpop.f32.mrf.mxu3 }
 0x5c2   : > { %v1212_v44 = vpop.f32.mrf.mxu1 }
 0x5c3   : > { %v1216_v45 = vadd.f32 %v1212_v44, %v1157_v43 }
 0x5c5   : > { %v1217_v46 = vpack.c.bf16 %v1216_v45, %v1216_v45 }
 0x5c7   : > { %2267 = vmatmul.msk.bf16.vlgmr.msra.gmra.mxu2 %vm863_vm0, %v1217_v46 }
 0x5ca   : > { %v1214_v47 = vpop.f32.mrf.mxu1 }
 0x5cb   : > { %v2459_v47 = vld [vmem:[%s3097_s15] ss:$0 sm:$0xff] }
 0x64a   : > { %v1250_v50 = vpop.f32.mrf.mxu2 }
 0x64b   : > { %v1251_v51 = vadd.f32 %v2455_v48, %v1250_v50 }
 0x64d   : > { %v1254_v52 = vadd.f32 %v1251_v51, %v2737_v36  ;;  %v2403_v36 = vld [vmem:[%s3094_s12] sm:$0xff] }
 0x64e   : > { %1318 = vmatpush.bf16.msra.mxu3 %v2403_v36 }
 0x64f   : > { %v1257_v53 = vsel %vm863_vm0, %v1254_v52, 0.0 }
 0x650   : > { %1258 = vadd.xlane.f32.xlu0 %v1257_v53 }
 0x652   : > { %v1252_v54 = vpop.f32.mrf.mxu2 }
 0x6c3   : > { %v1259_v55 = vpop.xlane.xlu0 %1258 }
 0x6c4   : > { %v1260_v56 = vmul.f32 %v1259_v55, %v2699_v8 }
 0x6c6   : > { %v1261_v58 = vsub.f32 %v1254_v52, %v1260_v56 }
 0x6c8   : > { %v1262_v59 = vmul.f32 %v1261_v58, %v1261_v58 }
 0x6ca   : > { %v1263_v60 = vsel %vm863_vm0, %v1262_v59, 0.0 }
 0x6cb   : > { %1264 = vadd.xlane.f32.xlu1 %v1263_v60  ;;  %v2410_v60 = vld [vmem:[%s3134_s5 + $0x18] sm:$0xff] }
 0x6cc   : > { %1465 = vmatpush.bf16.msrb.mxu2 %v2410_v60 }
 0x6d0   : > { %1466 = vmatpush.bf16.msrb.mxu2 %v2409_v61 }
 0x73e   : > { %v1265_v62 = vpop.xlane.xlu1 %1264 }
 0x73f   : > { %v1266_v0 = vmul.f32 %v1265_v62, %v2699_v8 }
 0x741   : > { %v1267_v1 = vadd.f32 1e-07, %v1266_v0 }
 0x743   : > { %2494 = vrsqrt.f32 %v1267_v1  ;;  %vm1274_vm3 = vweird.f32 %v1267_v1 }
 0x749   : > { %v2495_v2 = vpop.eup %2494 }
 0x74a   : > { %v1269_v3 = vmul.f32 %v2495_v2, %v1267_v1  ;;  %vm1275_vm2 = vweird.f32 %v2495_v2 }
 0x74b   : > { %vm1276_vm4 = vmor %vm1274_vm3, %vm1275_vm2 }
 0x74c   : > { %v1270_v4 = vmul.f32 %v2495_v2, %v1269_v3 }
 0x74e   : > { %v1271_v5 = vmul.f32 0.5, %v1270_v4 }
 0x750   : > { %v1272_v6 = vsub.f32 1.5, %v1271_v5 }
 0x752   : > { %v1273_v7 = vmul.f32 %v2495_v2, %v1272_v6 }
 0x754   : > { %v1277_v10 = vsel %vm1276_vm4, %v2495_v2, %v1273_v7  ;;  %v2460_v7 = vld [vmem:[%s3098_s16] ss:$0 sm:$0xff]  ;;  %vm2037_vm4 = vcmp.lt.s32.totalorder %v2722_v21, 64 }
 0x755   : > { %v1278_v12 = vmul.f32 %v1277_v10, %v1261_v58  ;;  %v2461_v10 = vld [vmem:[%s3099_s17] ss:$0 sm:$0xff] }
 0x757   : > { %v1282_v15 = vmul.f32 %v2456_v9, %v1278_v12 }
 0x759   : > { %v1286_v17 = vadd.f32 %v2457_v11, %v1282_v15 }
 0x75b   : > { %v1287_v18 = vpack.c.bf16 %v1286_v17, %v1286_v17 }
 0x75d   : > { %2276 = vmatmul.msk.bf16.vlgmr.msra.gmra.mxu3 %vm863_vm0, %v1287_v18 }
 0x7e0   : > { %v1320_v27 = vpop.f32.mrf.mxu3 }
 0x7e1   : > { %v1321_v28 = vadd.f32 %v2458_v26, %v1320_v27 }
 0x7e3   : > { %v1324_v29 = vmul.f32 %v1321_v28, %v1321_v28 }
 0x7e5   : > { %v1325_v30 = vmul.f32 %v1324_v29, %v1321_v28 }
 0x7e7   : > { %v1326_v42 = vmul.f32 0.044715, %v1325_v30 }
 0x7e8   : > { %v1322_v31 = vpop.f32.mrf.mxu3 }
 0x7e9   : > { %v1327_v32 = vadd.f32 %v1326_v42, %v1321_v28 }
 0x7eb   : > { %v1328_v33 = vmul.f32 0.7978846, %v1327_v32 }
 0x7ed   : > { %2496 = vtanh.f32 %v1328_v33 }
 0x7f3   : > { %v2497_v41 = vpop.eup %2496 }
 0x7f4   : > { %v1330_v43 = vadd.f32 1.0, %v2497_v41 }
 0x7f6   : > { %v1331_v44 = vmul.f32 0.5, %v1330_v43 }
 0x7f8   : > { %v1332_v45 = vmul.f32 %v1331_v44, %v1321_v28 }
 0x7fa   : > { %v1333_v46 = vpack.c.bf16 %v1332_v45, %v1332_v45 }
 0x7fc   : > { %2293 = vmatmul.msk.bf16.vlgmr.msrb.gmra.mxu0 %vm1370_vm5, %v1333_v46 }
 0x879   : > { %v1383_v48 = vpop.f32.mrf.mxu0 }
 0x87a   : > { %v1384_v50 = vadd.f32 %v2459_v47, %v1383_v48 }
 0x87c   : > { %v1387_v51 = vadd.f32 %v1384_v50, %v1286_v17 }
 0x87e   : > { %v1390_v52 = vsel %vm863_vm0, %v1387_v51, 0.0 }
 0x87f   : > { %1391 = vadd.xlane.f32.xlu2 %v1390_v52 }
 0x881   : > { %v1385_v53 = vpop.f32.mrf.mxu0 }
 0x8f2   : > { %v1392_v54 = vpop.xlane.xlu2 %1391 }
 0x8f3   : > { %v1393_v55 = vmul.f32 %v1392_v54, %v2699_v8 }
 0x8f5   : > { %v1394_v56 = vsub.f32 %v1387_v51, %v1393_v55 }
 0x8f7   : > { %v1395_v58 = vmul.f32 %v1394_v56, %v1394_v56 }
 0x8f9   : > { %v1396_v59 = vsel %vm863_vm0, %v1395_v58, 0.0 }
 0x8fa   : > { %1397 = vadd.xlane.f32.xlu1 %v1396_v59 }
 0x96d   : > { %v1398_v36 = vpop.xlane.xlu1 %1397 }
 0x96e   : > { %v1399_v62 = vmul.f32 %v1398_v36, %v2699_v8 }
 0x970   : > { %v1400_v0 = vadd.f32 1e-07, %v1399_v62 }
 0x972   : > { %2498 = vrsqrt.f32 %v1400_v0  ;;  %vm1407_vm7 = vweird.f32 %v1400_v0 }
 0x978   : > { %v2499_v1 = vpop.eup %2498 }
 0x979   : > { %v1402_v2 = vmul.f32 %v2499_v1, %v1400_v0  ;;  %vm1408_vm6 = vweird.f32 %v2499_v1 }
 0x97a   : > { %vm1409_vm8 = vmor %vm1407_vm7, %vm1408_vm6  ;;  %vm2062_vm7 = vcmask 7168  }
 0x97b   : > { %v1403_v3 = vmul.f32 %v2499_v1, %v1402_v2 }
 0x97d   : > { %v1404_v4 = vmul.f32 0.5, %v1403_v3 }
 0x97f   : > { %v1405_v5 = vsub.f32 1.5, %v1404_v4 }
 0x981   : > { %v1406_v6 = vmul.f32 %v2499_v1, %v1405_v5 }
 0x983   : > { %v1410_v9 = vsel %vm1409_vm8, %v2499_v1, %v1406_v6  ;;  %vm2125_vm8 = vcmp.eq.s32.totalorder %v2722_v21, 0 }
 0x984   : > { %v1411_v11 = vmul.f32 %v1410_v9, %v1394_v56 }
 0x986   : > { %v1415_v12 = vmul.f32 %v2460_v7, %v1411_v11 }
 0x988   : > { %v2898_v15 = vadd.f32 %v2461_v10, %v1415_v12 }
 0x98a   : > { %v1420_v17 = vpack.c.bf16 %v2898_v15, %v2898_v15 }
 0x98c   : > { %2294 = vmatmul.msk.bf16.vlgmr.msrb.gmra.mxu1 %vm863_vm0, %v1420_v17  ;;  %2308 = vmatmul.msk.bf16.vlgmr.msrb.gmra.mxu2 %vm863_vm0, %v1420_v17 }
 0xa09   : > { %v2904_v18 = vpop.f32.mrf.mxu1 }
 0xa0f   : > { %v1468_v20 = vpop.f32.mrf.mxu2 }
 0xa10   : > { %v2909_v22 = vadd.f32 %v2462_v19, %v1468_v20 }
 0xa11   : > { %v1435_v25 = vpop.f32.mrf.mxu1 }
 0xa12   : > { %v1472_v26 = vpack.c.bf16 %v2909_v22, %v2909_v22  ;;  %v1541_v27 = vmul.f32 %v2909_v22, %v2746_v39  ;;  %v1509_v30 = vmul.f32 %v2448_v37, %v2909_v22  ;;  %v1473_v39 = vmul.f32 %v2760_v49, %v2909_v22 }
 0xa13   : > { %v1511_v33 = vmul.f32 %v2727_v24, %v2909_v22  ;;  %v1587_v37 = vmul.f32 %v2773_v57, %v2909_v22  ;;  %v1642_v19 = vmul.f32 %v2803_v38, %v2909_v22 }
 0xa14   : > { %1476 = vrot.lane.b32.xlu2 %v1472_v26, %s3142_s27  ;;  %v1542_v28 = vpack.c.bf16 %v1541_v27, %v1541_v27  ;;  %v1510_v42 = vpack.c.bf16 %v1509_v30, %v1509_v30  ;;  %v1474_v41 = vpack.c.bf16 %v1473_v39, %v1473_v39 }
 0xa15   : > { %v1512_v43 = vpack.c.bf16 %v1511_v33, %v1511_v33  ;;  %v1588_v44 = vpack.c.bf16 %v1587_v37, %v1587_v37  ;;  %v1643_v20 = vpack.c.bf16 %v1642_v19, %v1642_v19  ;;  %v2414_v19 = vld [vmem:[%s3094_s12 + $0x18] sm:$0xff] }
 0xa16   : > { %1544 = vrot.lane.b32.xlu0 %v1542_v28, %s3143_s8 }
 0xa17   : > { %v1470_v29 = vpop.f32.mrf.mxu2 }
 0xa1e   : > { %1566 = vrot.lane.b32.xlu0 %v1510_v42, %s3143_s8 }
 0xa6e   : > { %v1477_v31 = vpop.permute.xlu2 %1476 }
 0xa6f   : > { %v1482_v32 = vsel %vm863_vm0, %v1477_v31, 0 }
 0xa70   : > { %1491 = vmatpush.bf16.xpose.msrb.mxu3 %v1482_v32  ;;  %1523 = vmatpush.bf16.xpose.msra.mxu0 %v1482_v32 }
 0xa77   : > { %2309 = vmatmul.msk.bf16.vlgmr.msrb.gmra.mxu3 %vm863_vm0, %v1474_v41  ;;  %2310 = vmatmul.msk.bf16.vlgmr.msra.gmra.mxu0 %vm863_vm0, %v1512_v43  ;;  %v1617_v41 = vmul.f32 %v2449_v35, %v2909_v22 }
 0xa78   : > { %1599 = vmatpush.bf16.xpose.msra.mxu3 %v1482_v32 }
 0xa79   : > { %v1618_v43 = vpack.c.bf16 %v1617_v41, %v1617_v41 }
 0xa87   : > { %2313 = vmatmul.msk.bf16.vlgmr.msra.gmra.mxu3 %vm863_vm0, %v1588_v44 }
 0xa88   : > { %v1545_v45 = vpop.permute.xlu0 %1544 }
 0xa89   : > { %v1550_v46 = vsel %vm1060_vm9, %v1545_v45, 0 }
 0xa8a   : > { %1559 = vmatpush.bf16.msra.mxu1 %v1550_v46 }
 0xa8e   : > { %1654 = vmatpush.bf16.xpose.msrb.mxu1 %v1482_v32 }
 0xa90   : > { %v1567_v49 = vpop.permute.xlu0 %1566 }
 0xa91   : > { %v1572_v24 = vsel %vm1060_vm9, %v1567_v49, 0 }
 0xa92   : > { %1581 = vmatpush.bf16.msra.mxu2 %v1572_v24 }
 0xaf4   : > { %v1525_v47 = vpop.f32.mrf.mxu0 }
 0xaf5   : > { %v1526_v48 = vadd.f32 %v1525_v47, %v2782_v63 }
 0xaf7   : > { %v1529_v50 = vsel %vm999_vm13, %v1526_v48, -inf }
 0xaf8   : > { %1530 = vmax.xlane.f32.xlu1 %v1529_v50 }
 0xafa   : > { %v1493_v51 = vpop.f32.mrf.mxu3 }
 0xafb   : > { %v1494_v61 = vadd.f32 %v1493_v51, %v2782_v63 }
 0xafc   : > { %v1527_v57 = vpop.f32.mrf.mxu0 }
 0xafd   : > { %v1497_v36 = vsel %vm999_vm13, %v1494_v61, -inf  ;;  %v1672_v57 = vmul.f32 %v2909_v22, %v2825_v13  ;;  %v2411_v22 = vld [vmem:[%s3139_s10 + $0x10] sm:$0xff] }
 0xb02   : > { %v1495_v52 = vpop.f32.mrf.mxu3 }
 0xb03   : > { %v1673_v52 = vpack.c.bf16 %v1672_v57, %v1672_v57 }
 0xb0a   : > { %v1601_v53 = vpop.f32.mrf.mxu3 }
 0xb0b   : > { %v1602_v62 = vadd.f32 %v1601_v53, %v2782_v63  ;;  %v2412_v53 = vld [vmem:[%s3139_s10 + $0x18] sm:$0xff] }
 0xb0c   : > { %1729 = vmatpush.bf16.msrb.mxu3 %v2412_v53 }
 0xb0d   : > { %v1605_v0 = vsel %vm999_vm13, %v1602_v62, -inf }
 0xb10   : > { %1730 = vmatpush.bf16.msrb.mxu3 %v2411_v22 }
 0xb12   : > { %v1603_v54 = vpop.f32.mrf.mxu3 }
 0xb6b   : > { %v1531_v55 = vpop.xlane.xlu1 %1530 }
 0xb6c   : > { %v1532_v56 = vsub.f32 %v1526_v48, %v1531_v55 }
 0xb6e   : > { %v1533_v58 = vmul.f32 1.442695, %v1532_v56 }
 0xb70   : > { %2500 = vpow2.f32 %v1533_v58 }
 0xb76   : > { %v2501_v59 = vpop.eup %2500 }
 0xb77   : > { %v1535_v60 = vsel %vm999_vm13, %v2501_v59, 0.0 }
 0xb78   : > { %1536 = vadd.xlane.f32.xlu1 %v1535_v60 }
 0xb80   : > { %1498 = vmax.xlane.f32.xlu1 %v1497_v36 }
 0xb88   : > { %1606 = vmax.xlane.f32.xlu1 %v1605_v0 }
 0xbeb   : > { %v1537_v1 = vpop.xlane.xlu1 %1536 }
 0xbec   : > { %2502 = vrcp.f32 %v1537_v1 }
 0xbf2   : > { %v2503_v2 = vpop.eup %2502 }
 0xbf3   : > { %v1539_v3 = vmul.f32 %v2503_v2, %v2501_v59  ;;  %v1499_v4 = vpop.xlane.xlu1 %1498 }
 0xbf4   : > { %v1500_v5 = vsub.f32 %v1494_v61, %v1499_v4  ;;  %v2463_v4 = vld [vmem:[%s3140_s9 + $0x1] ss:$0 sm:$0xff] }
 0xbf5   : > { %v1540_v6 = vpack.c.bf16 %v1539_v3, %v1539_v3 }
 0xbf6   : > { %v1501_v7 = vmul.f32 1.442695, %v1500_v5 }
 0xbf7   : > { %2311 = vmatmul.msk.bf16.vlgmr.msra.gmra.mxu1 %vm999_vm13, %v1540_v6 }
 0xbf8   : > { %2504 = vpow2.f32 %v1501_v7 }
 0xbfb   : > { %v1607_v9 = vpop.xlane.xlu1 %1606 }
 0xbfc   : > { %v1608_v10 = vsub.f32 %v1602_v62, %v1607_v9 }
 0xbfe   : > { %v2505_v11 = vpop.eup %2504  ;;  %v1609_v12 = vmul.f32 1.442695, %v1608_v10 }
 0xbff   : > { %v1503_v17 = vsel %vm999_vm13, %v2505_v11, 0.0 }
 0xc00   : > { %2506 = vpow2.f32 %v1609_v12  ;;  %1504 = vadd.xlane.f32.xlu1 %v1503_v17 }
 0xc06   : > { %v2507_v25 = vpop.eup %2506 }
 0xc07   : > { %2315 = vmatmul.msk.bf16.vlgmr.msrb.gmra.mxu1 %vm863_vm0, %v1643_v20  ;;  %v1611_v26 = vsel %vm999_vm13, %v2507_v25, 0.0 }
 0xc08   : > { %1612 = vadd.xlane.f32.xlu0 %v1611_v26 }
 0xc73   : > { %v1505_v27 = vpop.xlane.xlu1 %1504 }
 0xc74   : > { %2508 = vrcp.f32 %v1505_v27  ;;  %v1561_v28 = vpop.f32.mrf.mxu1 }
 0xc7a   : > { %v2509_v29 = vpop.eup %2508 }
 0xc7b   : > { %v1507_v30 = vmul.f32 %v2509_v29, %v2505_v11  ;;  %v1613_v37 = vpop.xlane.xlu0 %1612 }
 0xc7c   : > { %v1563_v42 = vpop.f32.mrf.mxu1  ;;  %2510 = vrcp.f32 %v1613_v37 }
 0xc7d   : > { %v1508_v31 = vpack.c.bf16 %v1507_v30, %v1507_v30 }
 0xc7f   : > { %2312 = vmatmul.msk.bf16.vlgmr.msra.gmra.mxu2 %vm999_vm13, %v1508_v31 }
 0xc82   : > { %v2511_v49 = vpop.eup %2510 }
 0xc83   : > { %v1615_v24 = vmul.f32 %v2511_v49, %v2507_v25  ;;  %v2415_v49 = vld [vmem:[%s3096_s14 + $0x20] sm:$0xff] }
 0xc84   : > { %v1656_v32 = vpop.f32.mrf.mxu1 }
 0xc85   : > { %v1657_v39 = vadd.f32 %v1656_v32, %v2782_v63  ;;  %v1616_v51 = vpack.c.bf16 %v1615_v24, %v1615_v24  ;;  %v2464_v32 = vld [vmem:[%s3141_s30 + $0x1] ss:$0 sm:$0xff] }
 0xc86   : > { %v2466_v24 = vld [vmem:[%s3095_s13 + $0x1] ss:$0 sm:$0xff] }
 0xc87   : > { %v1660_v38 = vsel %vm999_vm13, %v1657_v39, -inf }
 0xc88   : > { %1661 = vmax.xlane.f32.xlu2 %v1660_v38  ;;  %v2465_v38 = vld [vmem:[%s3093_s11 + $0x1] ss:$0 sm:$0xff] }
 0xc8c   : > { %v1658_v33 = vpop.f32.mrf.mxu1 }
 0xca0   : > { %1620 = vrot.lane.b32.xlu2 %v1618_v43, %s3143_s8 }
 0xcfb   : > { %v1662_v44 = vpop.xlane.xlu2 %1661 }
 0xcfc   : > { %v1663_v45 = vsub.f32 %v1657_v39, %v1662_v44  ;;  %v2418_v44 = vld [vmem:[%s3096_s14 + $0x38] sm:$0xff] }
 0xcfd   : > { %1865 = vmatpush.bf16.msra.mxu1 %v2418_v44 }
 0xcfe   : > { %v1664_v46 = vmul.f32 1.442695, %v1663_v45  ;;  %v2417_v45 = vld [vmem:[%s3096_s14 + $0x30] sm:$0xff] }
 0xd00   : > { %2512 = vpow2.f32 %v1664_v46  ;;  %v2416_v46 = vld [vmem:[%s3096_s14 + $0x28] sm:$0xff] }
 0xd01   : > { %1866 = vmatpush.bf16.msra.mxu1 %v2417_v45 }
 0xd02   : > { %v1583_v63 = vpop.f32.mrf.mxu2 }
 0xd03   : > { %v1621_v47 = vpop.permute.xlu2 %1620  ;;  %v1584_v54 = vadd.f32 %v1583_v63, %v1561_v28 }
 0xd04   : > { %v1626_v48 = vsel %vm1060_vm9, %v1621_v47, 0 }
 0xd05   : > { %1635 = vmatpush.bf16.msrb.mxu0 %v1626_v48  ;;  %1867 = vmatpush.bf16.msra.mxu1 %v2416_v46 }
 0xd06   : > { %v2513_v50 = vpop.eup %2512 }
 0xd07   : > { %v1666_v34 = vsel %vm999_vm13, %v2513_v50, 0.0 }
 0xd08   : > { %1667 = vadd.xlane.f32.xlu1 %v1666_v34  ;;  %2314 = vmatmul.msk.bf16.vlgmr.msrb.gmra.mxu0 %vm999_vm13, %v1616_v51 }
 0xd09   : > { %1803 = vmatpush.bf16.msra.mxu0 %v2414_v19  ;;  %1868 = vmatpush.bf16.msra.mxu1 %v2415_v49 }
 0xd0a   : > { %v1585_v35 = vpop.f32.mrf.mxu2 }
 0xd21   : > { %1675 = vrot.lane.b32.xlu1 %v1673_v52, %s3143_s8 }
 0xd7b   : > { %v1668_v56 = vpop.xlane.xlu1 %1667 }
 0xd7c   : > { %2514 = vrcp.f32 %v1668_v56 }
 0xd82   : > { %v2515_v60 = vpop.eup %2514 }
 0xd83   : > { %v1670_v61 = vmul.f32 %v2515_v60, %v2513_v50 }
 0xd85   : > { %v1637_v55 = vpop.f32.mrf.mxu0  ;;  %v1671_v13 = vpack.c.bf16 %v1670_v61, %v1670_v61 }
 0xd86   : > { %v1641_v58 = vadd.f32 %v1637_v55, %v1584_v54 }
 0xd8d   : > { %v1639_v59 = vpop.f32.mrf.mxu0 }
 0xd93   : > { %v1676_v36 = vpop.permute.xlu1 %1675 }
 0xd94   : > { %v1681_v62 = vsel %vm1060_vm9, %v1676_v36, 0 }
 0xd95   : > { %1690 = vmatpush.bf16.msrb.mxu2 %v1681_v62 }
 0xd98   : > { %2316 = vmatmul.msk.bf16.vlgmr.msrb.gmra.mxu2 %vm999_vm13, %v1671_v13 }
 0xd99   : > { %1919 = vmatpush.bf16.msra.mxu2 %v2706_v14 }
 0xd9d   : > { %1920 = vmatpush.bf16.msra.mxu2 %v2715_v16 }
 0xe1b   : > { %v1692_v0 = vpop.f32.mrf.mxu2 }
 0xe1c   : > { %v1696_v1 = vadd.f32 %v1692_v0, %v1641_v58  ;;  %v2467_v58 = vld [vmem:[%s3097_s15 + $0x1] ss:$0 sm:$0xff] }
 0xe1e   : > { %v1697_v2 = vpack.c.bf16 %v1696_v1, %v1696_v1 }
 0xe20   : > { %2330 = vmatmul.msk.bf16.vlgmr.msrb.gmra.mxu3 %vm863_vm0, %v1697_v2 }
 0xe23   : > { %v1694_v3 = vpop.f32.mrf.mxu2 }
 0xe24   : > { %v2420_v3 = vld [vmem:[%s3100_s18 + $0x8] sm:$0xff] }
 0xe25   : > { %1952 = vmatpush.bf16.msra.mxu3 %v2420_v3 }
 0xea3   : > { %v1732_v14 = vpop.f32.mrf.mxu3 }
 0xea4   : > { %v1733_v5 = vadd.f32 %v2463_v4, %v1732_v14  ;;  %v2419_v4 = vld [vmem:[%s3100_s18] sm:$0xff] }
 0xea5   : > { %1953 = vmatpush.bf16.msra.mxu3 %v2419_v4  ;;  %v2471_v4 = vld [vmem:[%s3102_s20] ss:$0 sm:$0xff] }
 0xea6   : > { %v1736_v6 = vadd.f32 %v1733_v5, %v2898_v15  ;;  %v2413_v15 = vld [vmem:[%s3094_s12 + $0x10] sm:$0xff] }
 0xea7   : > { %1804 = vmatpush.bf16.msra.mxu0 %v2413_v15 }
 0xea8   : > { %v1741_v16 = vsel %vm863_vm0, %v1736_v6, 0.0 }
 0xea9   : > { %1742 = vadd.xlane.f32.xlu1 %v1741_v16 }
 0xeab   : > { %v1734_v7 = vpop.f32.mrf.mxu3 }
 0xf1c   : > { %v1743_v9 = vpop.xlane.xlu1 %1742 }
 0xf1d   : > { %v1744_v10 = vmul.f32 %v1743_v9, %v2699_v8 }
 0xf1f   : > { %v1745_v11 = vsub.f32 %v1736_v6, %v1744_v10 }
 0xf21   : > { %v1746_v12 = vmul.f32 %v1745_v11, %v1745_v11 }
 0xf23   : > { %v1747_v17 = vsel %vm863_vm0, %v1746_v12, 0.0 }
 0xf24   : > { %1748 = vadd.xlane.f32.xlu0 %v1747_v17  ;;  %v2468_v17 = vld [vmem:[%s3098_s16 + $0x1] ss:$0 sm:$0xff] }
 0xf97   : > { %v1749_v20 = vpop.xlane.xlu0 %1748 }
 0xf98   : > { %v1750_v25 = vmul.f32 %v1749_v20, %v2699_v8  ;;  %v2469_v20 = vld [vmem:[%s3099_s17 + $0x1] ss:$0 sm:$0xff] }
 0xf9a   : > { %v1751_v26 = vadd.f32 1e-07, %v1750_v25 }
 0xf9c   : > { %2516 = vrsqrt.f32 %v1751_v26  ;;  %vm1758_vm10 = vweird.f32 %v1751_v26 }
 0xfa2   : > { %v2517_v27 = vpop.eup %2516 }
 0xfa3   : > { %v1753_v28 = vmul.f32 %v2517_v27, %v1751_v26  ;;  %vm1759_vm9 = vweird.f32 %v2517_v27 }
 0xfa4   : > { %vm1760_vm11 = vmor %vm1758_vm10, %vm1759_vm9  ;;  %vm2128_vm9 = vcmp.eq.s32.totalorder %v2722_v21, 1  ;;  %vm2132_vm10 = vcmp.eq.s32.totalorder %v2722_v21, 2 }
 0xfa5   : > { %v1754_v29 = vmul.f32 %v2517_v27, %v1753_v28  ;;  %v2453_v28 = vld [vmem:[%s3107_s25] ss:$0 sm:$0xff] }
 0xfa7   : > { %v1755_v30 = vmul.f32 0.5, %v1754_v29  ;;  %v2470_v29 = vld [vmem:[%s3101_s19] ss:$0 sm:$0xff] }
 0xfa9   : > { %v1756_v42 = vsub.f32 1.5, %v1755_v30  ;;  %v935_v30 = vadd.f32 %v2453_v28, %v2748_v40 }
 0xfab   : > { %v1757_v31 = vmul.f32 %v2517_v27, %v1756_v42 }
 0xfad   : > { %v1761_v39 = vsel %vm1760_vm11, %v2517_v27, %v1757_v31  ;;  %vm2135_vm11 = vcmp.eq.s32.totalorder %v2722_v21, 3 }
 0xfae   : > { %v1762_v33 = vmul.f32 %v1761_v39, %v1745_v11 }
 0xfb0   : > { %v1766_v41 = vmul.f32 %v2464_v32, %v1762_v33 }
 0xfb2   : > { %v1770_v43 = vadd.f32 %v2465_v38, %v1766_v41  ;;  %v2093_v38 = vmul.f32 0.5, %v935_v30 }
 0xfb4   : > { %v1771_v37 = vpack.c.bf16 %v1770_v43, %v1770_v43 }
 0xfb6   : > { %2346 = vmatmul.msk.bf16.vlgmr.msra.gmra.mxu0 %vm863_vm0, %v1771_v37 }
0x1033   : > { %v1806_v63 = vpop.f32.mrf.mxu0 }
0x1034   : > { %v1807_v47 = vadd.f32 %v2466_v24, %v1806_v63 }
0x1036   : > { %v1810_v48 = vmul.f32 %v1807_v47, %v1807_v47 }
0x1038   : > { %v1811_v50 = vmul.f32 %v1810_v48, %v1807_v47 }
0x103a   : > { %v1812_v51 = vmul.f32 0.044715, %v1811_v50 }
0x103b   : > { %v1808_v34 = vpop.f32.mrf.mxu0 }
0x103c   : > { %v1813_v35 = vadd.f32 %v1812_v51, %v1807_v47 }
0x103e   : > { %v1814_v57 = vmul.f32 0.7978846, %v1813_v35 }
0x1040   : > { %2518 = vtanh.f32 %v1814_v57 }
0x1046   : > { %v2519_v52 = vpop.eup %2518 }
0x1047   : > { %v1816_v53 = vadd.f32 1.0, %v2519_v52 }
0x1049   : > { %v1817_v54 = vmul.f32 0.5, %v1816_v53 }
0x104b   : > { %v1818_v55 = vmul.f32 %v1817_v54, %v1807_v47 }
0x104d   : > { %v1819_v56 = vpack.c.bf16 %v1818_v55, %v1818_v55 }
0x104f   : > { %2372 = vmatmul.msk.bf16.vlgmr.msra.gmra.mxu1 %vm1370_vm5, %v1819_v56  ;;  %v2422_v56 = vld [vmem:[%s3104_s22 + $0x8] sm:$0xff] }
0x1050   : > { %2030 = vmatpush.bf16.msrb.mxu0 %v2422_v56 }
0x10cc   : > { %v1870_v59 = vpop.f32.mrf.mxu1 }
0x10cd   : > { %v1871_v60 = vadd.f32 %v2467_v58, %v1870_v59  ;;  %v2421_v58 = vld [vmem:[%s3104_s22] sm:$0xff] }
0x10ce   : > { %2031 = vmatpush.bf16.msrb.mxu0 %v2421_v58  ;;  %v2049_v59 = vld [vmem:[%s829_s6] sm:$0xff]  ;;  %s825_s6 = scalar_lea.vmem %s3145_s2, %s2692_s7 }
0x10cf   : > { %v1874_v61 = vadd.f32 %v1871_v60, %v1770_v43  ;;  %v1434_v43 = vadd.f32 %v2453_v28, %v2904_v18  ;;  %vm2050_vm6 = vcmp.ge.s32.totalorder %v2049_v59, 0 }
0x10d1   : > { %v1879_v36 = vsel %vm863_vm0, %v1874_v61, 0.0 }
0x10d2   : > { %1880 = vadd.xlane.f32.xlu2 %v1879_v36 }
0x10d4   : > { %v1872_v62 = vpop.f32.mrf.mxu1 }
0x1145   : > { %v1881_v13 = vpop.xlane.xlu2 %1880 }
0x1146   : > { %v1882_v22 = vmul.f32 %v1881_v13, %v2699_v8 }
0x1148   : > { %v1883_v0 = vsub.f32 %v1874_v61, %v1882_v22  ;;  %v2544_v61 = vmov 0  }
0x1149   : > { %2450 = vset.pattern.permute.xlu0 %v2544_v61 }
0x114a   : > { %v1884_v1 = vmul.f32 %v1883_v0, %v1883_v0 }
0x114c   : > { %v1885_v2 = vsel %vm863_vm0, %v1884_v1, 0.0 }
0x114d   : > { %1886 = vadd.xlane.f32.xlu0 %v1885_v2 }
0x11c0   : > { %v1887_v14 = vpop.xlane.xlu0 %1886 }
0x11c1   : > { %v1888_v5 = vmul.f32 %v1887_v14, %v2699_v8 }
0x11c3   : > { %v1889_v6 = vadd.f32 1e-07, %v1888_v5 }
0x11c5   : > { %2520 = vrsqrt.f32 %v1889_v6  ;;  %vm1896_vm13 = vweird.f32 %v1889_v6 }
0x11cb   : > { %v2521_v16 = vpop.eup %2520 }
0x11cc   : > { %v1891_v7 = vmul.f32 %v2521_v16, %v1889_v6  ;;  %vm1897_vm12 = vweird.f32 %v2521_v16 }
0x11cd   : > { %vm1898_vm14 = vmor %vm1896_vm13, %vm1897_vm12 }
0x11ce   : > { %v1892_v9 = vmul.f32 %v2521_v16, %v1891_v7 }
0x11d0   : > { %v1893_v10 = vmul.f32 0.5, %v1892_v9  ;;  %v2473_v9 = vld [vmem:[%s3105_s23] ss:$0 sm:$0xff] }
0x11d2   : > { %v1894_v11 = vsub.f32 1.5, %v1893_v10 }
0x11d4   : > { %v1895_v12 = vmul.f32 %v2521_v16, %v1894_v11 }
0x11d6   : > { %v1899_v19 = vsel %vm1898_vm14, %v2521_v16, %v1895_v12 }
0x11d7   : > { %v1900_v15 = vmul.f32 %v1899_v19, %v1883_v0  ;;  %v2545_v19 = vmov 0.5  }
0x11d9   : > { %v1904_v25 = vmul.f32 %v2468_v17, %v1900_v15 }
0x11db   : > { %v1908_v26 = vadd.f32 %v2469_v20, %v1904_v25 }
0x11dd   : > { %v1909_v27 = vpack.c.bf16 %v1908_v26, %v1908_v26 }
0x11df   : > { %2375 = vmatmul.msk.bf16.vlgmr.msra.gmra.mxu2 %vm863_vm0, %v1909_v27  ;;  %2384 = vmatmul.msk.bf16.vlgmr.msra.gmra.mxu3 %vm863_vm0, %v1909_v27 }
0x1262   : > { %v1922_v42 = vpop.f32.mrf.mxu2  ;;  %v1955_v31 = vpop.f32.mrf.mxu3 }
0x1263   : > { %v1923_v32 = vadd.f32 %v2453_v28, %v1922_v42  ;;  %v1956_v39 = vadd.f32 %v2470_v29, %v1955_v31 }
0x1265   : > { %v2094_v33 = vmul.f32 0.5, %v1923_v32  ;;  %v1959_v41 = vmul.f32 %v1956_v39, %v1956_v39 }
0x1267   : > { %v2095_v37 = vadd.f32 %v2094_v33, %v2093_v38  ;;  %v1960_v44 = vmul.f32 %v1959_v41, %v1956_v39  ;;  %v2394_v41 = vsel %vm2050_vm6, 1.0, %v2541_v23 }
0x1269   : > { %v1961_v45 = vmul.f32 0.044715, %v1960_v44  ;;  %v2096_v46 = vsub.f32 %v1434_v43, %v2095_v37  ;;  %v2073_v37 = vsel %vm2062_vm7, %v2394_v41, 0.0 }
0x126a   : > { %v1924_v49 = vpop.f32.mrf.mxu2  ;;  %v1957_v24 = vpop.f32.mrf.mxu3 }
0x126b   : > { %v2097_v63 = vmul.f32 %v2096_v46, %v2096_v46  ;;  %v1962_v47 = vadd.f32 %v1961_v45, %v1956_v39  ;;  %v837_v45 = vld [vmem:[%s825_s6] sm:$0xff] }
0x126d   : > { %v2099_v48 = vsel %vm2098_vm15, %v2097_v63, 0.0  ;;  %v1963_v40 = vmul.f32 0.7978846, %v1962_v47 }
0x126e   : > { %2100 = vadd.xlane.f32.xlu2 %v2099_v48 }
0x126f   : > { %2522 = vtanh.f32 %v1963_v40 }
0x1275   : > { %v2523_v50 = vpop.eup %2522 }
0x1276   : > { %v1965_v51 = vadd.f32 1.0, %v2523_v50 }
0x1278   : > { %v1966_v34 = vmul.f32 0.5, %v1965_v51 }
0x127a   : > { %v1967_v35 = vmul.f32 %v1966_v34, %v1956_v39  ;;  %v2083_v34 = vsel %vm2062_vm7, %v837_v45, 0.0 }
0x127c   : > { %v1970_v18 = vsel %vm863_vm0, %v1967_v35, 0.0 }
0x127d   : > { %1971 = vadd.xlane.f32.xlu0 %v1970_v18 }
0x12e1   : > { %v2101_v39 = vpop.xlane.xlu2 %2100 }
0x12f0   : > { %v1972_v57 = vpop.xlane.xlu0 %1971 }
0x12f1   : > { %v1973_v52 = vmul.f32 %v1972_v57, %v2699_v8 }
0x12f3   : > { %v1974_v53 = vsub.f32 %v1967_v35, %v1973_v52 }
0x12f5   : > { %v1975_v54 = vmul.f32 %v1974_v53, %v1974_v53 }
0x12f7   : > { %v1976_v55 = vsel %vm863_vm0, %v1975_v54, 0.0 }
0x12f8   : > { %1977 = vadd.xlane.f32.xlu0 %v1976_v55 }
0x130c   : > { %2054 = vperm.xlu0 %2450, %v2049_v59  }
0x136b   : > { %v1978_v60 = vpop.xlane.xlu0 %1977 }
0x136c   : > { %v1979_v36 = vmul.f32 %v1978_v60, %v2699_v8  ;;  %v2472_v8 = vld [vmem:[%s3103_s21] ss:$0 sm:$0xff] }
0x136e   : > { %v1980_v62 = vadd.f32 1e-07, %v1979_v36 }
0x1370   : > { %2524 = vrsqrt.f32 %v1980_v62  ;;  %vm1987_vm2 = vweird.f32 %v1980_v62 }
0x1371   : > { %2526 = vrcp.f32 %v2545_v19 }
0x1376   : > { %v2525_v13 = vpop.eup %2524 }
0x1377   : > { %v1982_v22 = vmul.f32 %v2525_v13, %v1980_v62  ;;  %vm1988_vm1 = vweird.f32 %v2525_v13  ;;  %v2527_v15 = vpop.eup %2526 }
0x1378   : > { %vm1989_vm3 = vmor %vm1987_vm2, %vm1988_vm1  ;;  %v2103_v20 = vmul.f32 0.5, %v2527_v15 }
0x1379   : > { %v1983_v0 = vmul.f32 %v2525_v13, %v1982_v22 }
0x137a   : > { %v2104_v28 = vsub.f32 1.0, %v2103_v20 }
0x137b   : > { %v1984_v1 = vmul.f32 0.5, %v1983_v0 }
0x137c   : > { %v2105_v29 = vmul.f32 %v2527_v15, %v2104_v28 }
0x137d   : > { %v1985_v2 = vsub.f32 1.5, %v1984_v1 }
0x137e   : > { %v2106_v42 = vadd.f32 %v2527_v15, %v2105_v29  ;;  %v2055_v31 = vpop.permute.xlu0 %2054 }
0x137f   : > { %v1986_v3 = vmul.f32 %v2525_v13, %v1985_v2  ;;  %vm2056_vm5 = vcmp.eq.s32.totalorder %v2722_v21, %v2055_v31 }
0x1381   : > { %v1990_v14 = vsel %vm1989_vm3, %v2525_v13, %v1986_v3 }
0x1382   : > { %v1991_v5 = vmul.f32 %v1990_v14, %v1974_v53 }
0x1384   : > { %v1995_v6 = vmul.f32 %v2471_v4, %v1991_v5 }
0x1386   : > { %v1999_v16 = vadd.f32 %v2472_v8, %v1995_v6 }
0x1388   : > { %v2000_v7 = vpack.c.bf16 %v1999_v16, %v1999_v16 }
0x138a   : > { %2393 = vmatmul.msk.bf16.vlgmr.msrb.gmra.mxu0 %vm863_vm0, %v2000_v7  ;;  %vm2107_vm0 = vweird.f32 %v2527_v15 }
0x138b   : > { %v2108_v32 = vsel %vm2107_vm0, %v2527_v15, %v2106_v42 }
0x138c   : > { %v2109_v38 = vmul.f32 %v2108_v32, %v2101_v39 }
0x138e   : > { %v2110_v43 = vadd.f32 18.315678, %v2109_v38 }
0x1390   : > { %v2111_v44 = vmul.f32 0.5, %v2110_v43 }
0x1392   : > { %v2112_v46 = vmul.f32 %v2111_v44, %v837_v45 }
0x1394   : > { %v2113_v49 = vsel %vm2062_vm7, %v2112_v46, 0.0 }
0x1407   : > { %v2033_v10 = vpop.f32.mrf.mxu0 }
0x1408   : > { %v2034_v11 = vadd.f32 %v2473_v9, %v2033_v10 }
0x140a   : > { %v2038_v12 = vsel %vm2037_vm4, %v2034_v11, -1e+30  ;;  %v2057_v33 = vsel %vm2056_vm5, %v2034_v11, 0.0 }
0x140b   : > { %2039 = vmax.xlane.f32.xlu1 %v2038_v12 }
0x140f   : > { %v2035_v17 = vpop.f32.mrf.mxu0 }
0x147e   : > { %v2040_v25 = vpop.xlane.xlu1 %2039 }
0x147f   : > { %v2041_v26 = vsub.f32 %v2038_v12, %v2040_v25 }
0x1481   : > { %v2042_v27 = vmul.f32 1.442695, %v2041_v26 }
0x1483   : > { %2528 = vpow2.f32 %v2042_v27 }
0x1489   : > { %v2529_v30 = vpop.eup %2528 }
0x148a   : > { %2044 = vadd.xlane.f32.xlu1 %v2529_v30 }
0x1492   : > { %2058 = vadd.xlane.f32.xlu1 %v2057_v33 }
0x149a   : > { %2074 = vadd.xlane.f32.xlu1 %v2073_v37 }
0x14a2   : > { %2114 = vadd.xlane.f32.xlu1 %v2113_v49 }
0x14fd   : > { %v2045_v24 = vpop.xlane.xlu1 %2044 }
0x14fe   : > { %2530 = vlog2.f32 %v2045_v24 }
0x1504   : > { %v2531_v63 = vpop.eup %2530 }
0x1505   : > { %v2047_v47 = vmul.f32 0.6931472, %v2531_v63  ;;  %v2059_v48 = vpop.xlane.xlu1 %2058 }
0x1507   : > { %v2048_v23 = vadd.f32 %v2047_v47, %v2040_v25 }
0x1509   : > { %v2060_v40 = vsub.f32 %v2048_v23, %v2059_v48 }
0x150b   : > { %v2061_v50 = vmul.f32 %v2394_v41, %v2060_v40 }
0x150d   : > { %v2063_v51 = vsel %vm2062_vm7, %v2061_v50, 0.0  ;;  %v2075_v35 = vpop.xlane.xlu1 %2074 }
0x150e   : > { %2064 = vadd.xlane.f32.xlu2 %v2063_v51  ;;  %v2076_v18 = vrot.slane %v2075_v35, 4 }
0x1510   : > { %v2077_v57 = vadd.f32 %v2076_v18, %v2075_v35 }
0x1512   : > { %v2078_v53 = vrot.slane %v2077_v57, 2 }
0x1514   : > { %v2079_v60 = vadd.f32 %v2078_v53, %v2077_v57 }
0x1515   : > { %v2115_v52 = vpop.xlane.xlu1 %2114 }
0x1516   : > { %2084 = vadd.xlane.f32.xlu2 %v2083_v34  ;;  %v2116_v54 = vrot.slane %v2115_v52, 4  ;;  %v2080_v22 = vrot.slane %v2079_v60, 1 }
0x1518   : > { %v2117_v59 = vadd.f32 %v2116_v54, %v2115_v52  ;;  %v2081_v14 = vadd.f32 %v2080_v22, %v2079_v60 }
0x151a   : > { %v2118_v62 = vrot.slane %v2117_v59, 2 }
0x151c   : > { %v2119_v4 = vadd.f32 %v2118_v62, %v2117_v59 }
0x151e   : > { %v2120_v6 = vrot.slane %v2119_v4, 1 }
0x1520   : > { %v2121_v9 = vadd.f32 %v2120_v6, %v2119_v4 }
0x1581   : > { %v2065_v55 = vpop.xlane.xlu2 %2064 }
0x1582   : > { %v2066_v56 = vrot.slane %v2065_v55, 4 }
0x1584   : > { %v2067_v58 = vadd.f32 %v2066_v56, %v2065_v55 }
0x1586   : > { %v2068_v61 = vrot.slane %v2067_v58, 2 }
0x1588   : > { %v2069_v36 = vadd.f32 %v2068_v61, %v2067_v58 }
0x1589   : > { %v2085_v13 = vpop.xlane.xlu2 %2084 }
0x158a   : > { %v2086_v0 = vrot.slane %v2085_v13, 4  ;;  %v2070_v1 = vrot.slane %v2069_v36, 1 }
0x158c   : > { %v2087_v2 = vadd.f32 %v2086_v0, %v2085_v13  ;;  %v2071_v3 = vadd.f32 %v2070_v1, %v2069_v36 }
0x158e   : > { %v2088_v5 = vrot.slane %v2087_v2, 2  ;;  %2423 = vpush %v2071_v3 }
0x158f   : > { %2425 = vpush %v2081_v14 }
0x1590   : > { %v2089_v8 = vadd.f32 %v2088_v5, %v2087_v2 }
0x1592   : > { %v2090_v16 = vrot.slane %v2089_v8, 1 }
0x1594   : > { %v2091_v7 = vadd.f32 %v2090_v16, %v2089_v8 }
0x1596   : > { %2427 = vpush %v2091_v7 }
0x1597   : > { %2429 = vpush %v2121_v9 }
0x15bf   : > { %s2424_s7 = spop %2423 }
0x15c0   : > { %s2426_s24 = spop %2425  ;;  %v2126_v10 = vstv %s2424_s7 }
0x15c1   : > { %v2129_v11 = vstv %s2426_s24  ;;  %v2127_v12 = vsel %vm2125_vm8, %v2126_v10, 0.0 }
0x15c2   : > { %v2130_v17 = vsel %vm2128_vm9, %v2129_v11, 0.0 }
0x15c3   : > { %v2131_v19 = vadd.f32 %v2130_v17, %v2127_v12 }
0x15c7   : > { %s2428_s26 = spop %2427 }
0x15c8   : > { %s2430_s27 = spop %2429  ;;  %v2136_v15 = vstv %s2428_s26 }
0x15c9   : > { %v2123_v20 = vstv %s2430_s27  ;;  %v2137_v27 = vsel %vm2135_vm11, %v2136_v15, 0.0 }
0x15ca   : > { %v2133_v25 = vsel %vm2132_vm10, %v2123_v20, 0.0 }
0x15cb   : > { %v2134_v26 = vadd.f32 %v2133_v25, %v2131_v19 }
0x15cd   : > { %v2138_v28 = vadd.f32 %v2137_v27, %v2134_v26 }
0x15cf   : > { %2139 = vst [vmem:[%s832_s29] sm:$0x1] %v2138_v28 }
0x15d0 PF: > { %s3147_s0 = sld [smem:[#allocation2_spill]] }
0x15d6   : > { %s36_s27 = sadd.s32 1, %s3147_s0  }
0x15d7   : > { %p33_p4 = scmp.ge.s32.totalorder %s36_s27, 4  }
0x15d9   :  { %35 = sbr.rel (!%p33_p4) target bundleno = 14 (0xe), region = 175 }

</bundles_post_ra>
